<compile_context>
chip_gen: v7x
topology: tpu7x:2x2x1
jax: 0.10.0
libtpu: 0.0.40
codegen_flags: <defaults>
</compile_context>

<pallas_src>
import jax
import jax.numpy as jnp
from jax.experimental import pallas as pl
from jax.experimental.pallas import tpu as pltpu

B = 8            # batch
D_IN = 2         # fc1 input features
H = 1000         # logical hidden width (as in the PyTorch module)
H_PAD = 1024     # hidden width padded to 8 * 128 lanes
H_HALF = H_PAD // 2
LANE = 128
D_OUT = 1        # fc3 output


# ----------------------------------------------------------------------------- kernels
def mlp_kernel(x_ref, w1_ref, b1_ref, w2_ref, b2_ref, w3t_ref, b3_ref, o_ref):
    """Single fused block: fc1+ReLU (VPU), fc2 (one MXU dot), fc3+sigmoid epilogue."""
    x = x_ref[...]                                # (B, 2)      f32
    w1 = w1_ref[...]                              # (2, H_PAD)  f32
    # fc1: K=2 contraction on the VPU (MXU would be wasted on a 2-wide dot).
    h1 = x[:, 0:1] * w1[0:1, :] + x[:, 1:2] * w1[1:2, :] + b1_ref[...]
    h1 = jnp.maximum(h1, 0.0)                     # (B, H_PAD)  f32
    # fc2: single (1024,1024) bf16 MXU dot, f32 accumulation.
    h2 = jnp.dot(h1.astype(jnp.bfloat16), w2_ref[...],
                 preferred_element_type=jnp.float32)
    h2 = jnp.maximum(h2 + b2_ref[...], 0.0)       # (B, H_PAD)  f32
    # fc3: N=1 -> VPU multiply + lane reduction, then sigmoid.
    z = jnp.sum(h2 * w3t_ref[...], axis=-1, keepdims=True) + b3_ref[...]
    o_ref[...] = 1.0 / (1.0 + jnp.exp(-z))        # (B, 1)


def mlp_split_kernel(x_ref, w1_ref, b1_ref, w2_ref, b2_ref, w3t_ref, o_ref):
    """v7x 2-TensorCore path: this grid step handles one column half of w2/b2/w3^T and
    writes its partial fc3 dot, lane-padded to (B, 128).  Bias + sigmoid in wrapper."""
    x = x_ref[...]                                # (B, 2)       f32
    w1 = w1_ref[...]                              # (2, H_PAD)   f32
    h1 = x[:, 0:1] * w1[0:1, :] + x[:, 1:2] * w1[1:2, :] + b1_ref[...]
    h1 = jnp.maximum(h1, 0.0)                     # (B, H_PAD)   f32
    h2 = jnp.dot(h1.astype(jnp.bfloat16), w2_ref[...],
                 preferred_element_type=jnp.float32)
    h2 = jnp.maximum(h2 + b2_ref[...], 0.0)       # (B, H_HALF)  f32
    z_part = jnp.sum(h2 * w3t_ref[...], axis=-1, keepdims=True)  # (B, 1)
    o_ref[...] = jnp.broadcast_to(z_part, (B, LANE))              # lane-dense store


# ----------------------------------------------------------------------------- wrappers
def _cost(w2p):
    return pl.CostEstimate(
        flops=2 * B * H_PAD * H_PAD + 2 * B * D_IN * H_PAD + 2 * B * H_PAD,
        transcendentals=B,
        bytes_accessed=int(w2p.size) * w2p.dtype.itemsize
        + 4 * (B * D_IN + D_IN * H_PAD + 3 * H_PAD + 1 + B * D_OUT),
    )


def _forward_single(x, w1p, b1p, w2p, b2p, w3tp, b3p):
    # No grid: whole (padded) arrays live in VMEM (~2.1 MiB total), one kernel invocation.
    return pl.pallas_call(
        mlp_kernel,
        out_shape=jax.ShapeDtypeStruct((B, D_OUT), jnp.float32),
        compiler_params=pltpu.CompilerParams(vmem_limit_bytes=16 << 20),
        cost_estimate=_cost(w2p),
    )(x, w1p, b1p, w2p, b2p, w3tp, b3p)


def _forward_split(x, w1p, b1p, w2p, b2p, w3tp, b3p):
    partials = pl.pallas_call(
        mlp_split_kernel,
        out_shape=jax.ShapeDtypeStruct((B, 2 * LANE), jnp.float32),
        grid_spec=pltpu.PrefetchScalarGridSpec(
            num_scalar_prefetch=0,
            grid=(2,),  # column halves -> one per TensorCore on v7x
            in_specs=[
                pl.BlockSpec((B, D_IN), lambda j: (0, 0)),       # x      (replicated)
                pl.BlockSpec((D_IN, H_PAD), lambda j: (0, 0)),   # w1     (replicated)
                pl.BlockSpec((1, H_PAD), lambda j: (0, 0)),      # b1     (replicated)
                pl.BlockSpec((H_PAD, H_HALF), lambda j: (0, j)), # w2 half (the big stream)
                pl.BlockSpec((1, H_HALF), lambda j: (0, j)),     # b2 half
                pl.BlockSpec((1, H_HALF), lambda j: (0, j)),     # w3^T half
            ],
            out_specs=pl.BlockSpec((B, LANE), lambda j: (0, j)),
        ),
        compiler_params=pltpu.CompilerParams(
            dimension_semantics=("parallel",),
            vmem_limit_bytes=16 << 20,
        ),
        cost_estimate=_cost(w2p),
    )(x, w1p, b1p, w2p, b2p, w3tp)
    z = partials[:, 0:1] + partials[:, LANE:LANE + 1] + b3p
    return 1.0 / (1.0 + jnp.exp(-z))


def _use_two_core_split():
    """Enable the column-split path only on 2-TensorCore chips (v7x)."""
    try:
        kind = jax.devices()[0].device_kind.lower()
    except Exception:
        return False
    return ("v7" in kind) or ("7x" in kind)


def net_forward(x, w1p, b1p, w2p, b2p, w3tp, b3p, *, two_core_split=None):
    """x: (B, D_IN) f32. Params already padded to H_PAD; w2p is bf16; w3tp is w3 transposed."""
    if two_core_split is None:
        two_core_split = _use_two_core_split()
    if two_core_split:
        return _forward_split(x, w1p, b1p, w2p, b2p, w3tp, b3p)
    return _forward_single(x, w1p, b1p, w2p, b2p, w3tp, b3p)


# ----------------------------------------------------------------------------- params
def init_params(key):
    # Deterministic init mimicking PyTorch Linear default (uniform +/- 1/sqrt(fan_in)).
    k1, k2, k3, k4, k5, k6 = jax.random.split(key, 6)

    def u(k, shape, fan_in):
        bound = 1.0 / jnp.sqrt(fan_in)
        return jax.random.uniform(k, shape, jnp.float32, -bound, bound)

    w1 = u(k1, (D_IN, H), D_IN)
    b1 = u(k2, (1, H), D_IN)
    w2 = u(k3, (H, H), H)
    b2 = u(k4, (1, H), H)
    w3 = u(k5, (H, D_OUT), H)
    b3 = u(k6, (1, D_OUT), H)
    return w1, b1, w2, b2, w3, b3


def prepare_params(w1, b1, w2, b2, w3, b3):
    """One-time host-side prep: zero-pad H -> H_PAD, store w2 in bf16, transpose w3.
    Zero pads are exact: ReLU(0)=0 and the padded w2/w3^T rows/cols are zero."""
    p = H_PAD - H
    w1p = jnp.pad(w1, ((0, 0), (0, p)))                       # (2, H_PAD)      f32
    b1p = jnp.pad(b1, ((0, 0), (0, p)))                       # (1, H_PAD)      f32
    w2p = jnp.pad(w2.astype(jnp.bfloat16), ((0, p), (0, p)))  # (H_PAD, H_PAD)  bf16
    b2p = jnp.pad(b2, ((0, 0), (0, p)))                       # (1, H_PAD)      f32
    w3tp = jnp.pad(w3.T, ((0, 0), (0, p)))                    # (1, H_PAD)      f32
    return w1p, b1p, w2p, b2p, w3tp, b3


def reference(x, w1, b1, w2, b2, w3, b3):
    hp = jax.lax.Precision.HIGHEST
    h1 = jnp.maximum(jnp.dot(x, w1, precision=hp) + b1, 0.0)
    h2 = jnp.maximum(jnp.dot(h1, w2, precision=hp) + b2, 0.0)
    return jax.nn.sigmoid(jnp.dot(h2, w3, precision=hp) + b3)


if __name__ == "__main__":
    key = jax.random.PRNGKey(0)
    kx, kp = jax.random.split(key)
    x = jax.random.normal(kx, (B, D_IN), jnp.float32)
    w1, b1, w2, b2, w3, b3 = init_params(kp)

    prepared = prepare_params(w1, b1, w2, b2, w3, b3)
    out = net_forward(x, *prepared)
    jax.block_until_ready(out)

    # Reference uses the same bf16-rounded w2 the kernel consumes (storage decision);
    # everything else in f32.
    w2_ref = w2.astype(jnp.bfloat16).astype(jnp.float32)
    ref = reference(x, w1, b1, w2_ref, b2, w3, b3)

    assert out.shape == (B, D_OUT)
    err = float(jnp.max(jnp.abs(out - ref)))
    assert jnp.allclose(out, ref, atol=2e-3, rtol=2e-3), err
    print("KERNEL_OK")
</pallas_src>

<mosaic_0001>
module attributes {stable_mosaic.version = 11 : i64} {
  func.func @mlp_kernel(%arg0: memref<8x2xf32, #tpu.memory_space<vmem>>, %arg1: memref<2x1024xf32, #tpu.memory_space<vmem>>, %arg2: memref<1x1024xf32, #tpu.memory_space<vmem>>, %arg3: memref<1024x1024xbf16, #tpu.memory_space<vmem>>, %arg4: memref<1x1024xf32, #tpu.memory_space<vmem>>, %arg5: memref<1x1024xf32, #tpu.memory_space<vmem>>, %arg6: memref<1x1xf32, #tpu.memory_space<vmem>>, %arg7: memref<8x1xf32, #tpu.memory_space<vmem>>) attributes {dimension_semantics = [], scalar_prefetch = 0 : i64, scratch_operands = 0 : i64, tpu.core_type = #tpu.core_type<tc>} {
    %c0 = arith.constant 0 : index
    %c0_0 = arith.constant 0 : index
    %0 = vector.load %arg0[%c0, %c0_0] : memref<8x2xf32, #tpu.memory_space<vmem>>, vector<8x2xf32>
    %c0_1 = arith.constant 0 : index
    %c0_2 = arith.constant 0 : index
    %1 = vector.load %arg1[%c0_1, %c0_2] : memref<2x1024xf32, #tpu.memory_space<vmem>>, vector<2x1024xf32>
    %2 = vector.extract_strided_slice %0 {offsets = [0, 0], sizes = [8, 1], strides = [1, 1]} : vector<8x2xf32> to vector<8x1xf32>
    %3 = vector.extract_strided_slice %1 {offsets = [0, 0], sizes = [1, 1024], strides = [1, 1]} : vector<2x1024xf32> to vector<1x1024xf32>
    %4 = vector.broadcast %2 : vector<8x1xf32> to vector<8x1024xf32>
    %5 = vector.broadcast %3 : vector<1x1024xf32> to vector<8x1024xf32>
    %6 = arith.mulf %4, %5 : vector<8x1024xf32>
    %7 = vector.extract_strided_slice %0 {offsets = [0, 1], sizes = [8, 1], strides = [1, 1]} : vector<8x2xf32> to vector<8x1xf32>
    %8 = vector.extract_strided_slice %1 {offsets = [1, 0], sizes = [1, 1024], strides = [1, 1]} : vector<2x1024xf32> to vector<1x1024xf32>
    %9 = vector.broadcast %7 : vector<8x1xf32> to vector<8x1024xf32>
    %10 = vector.broadcast %8 : vector<1x1024xf32> to vector<8x1024xf32>
    %11 = arith.mulf %9, %10 : vector<8x1024xf32>
    %12 = arith.addf %6, %11 : vector<8x1024xf32>
    %c0_3 = arith.constant 0 : index
    %c0_4 = arith.constant 0 : index
    %13 = vector.load %arg2[%c0_3, %c0_4] : memref<1x1024xf32, #tpu.memory_space<vmem>>, vector<1x1024xf32>
    %14 = vector.broadcast %13 : vector<1x1024xf32> to vector<8x1024xf32>
    %15 = arith.addf %12, %14 : vector<8x1024xf32>
    %cst = arith.constant 0.000000e+00 : f32
    %16 = vector.broadcast %cst : f32 to vector<8x1024xf32>
    %17 = arith.maximumf %15, %16 : vector<8x1024xf32>
    %18 = arith.truncf %17 : vector<8x1024xf32> to vector<8x1024xbf16>
    %c0_5 = arith.constant 0 : index
    %c0_6 = arith.constant 0 : index
    %19 = vector.load %arg3[%c0_5, %c0_6] : memref<1024x1024xbf16, #tpu.memory_space<vmem>>, vector<1024x1024xbf16>
    %cst_7 = arith.constant dense<0.000000e+00> : vector<8x1024xf32>
    %20 = tpu.matmul %18, %19, %cst_7 {dimension_numbers = #tpu.dot_dimension_numbers<[1], [0], [0], [1], [0, 0, 1, 1], [], []>} : vector<8x1024xbf16>, vector<1024x1024xbf16>, vector<8x1024xf32> -> vector<8x1024xf32>
    %c0_8 = arith.constant 0 : index
    %c0_9 = arith.constant 0 : index
    %21 = vector.load %arg4[%c0_8, %c0_9] : memref<1x1024xf32, #tpu.memory_space<vmem>>, vector<1x1024xf32>
    %22 = vector.broadcast %21 : vector<1x1024xf32> to vector<8x1024xf32>
    %23 = arith.addf %20, %22 : vector<8x1024xf32>
    %cst_10 = arith.constant 0.000000e+00 : f32
    %24 = vector.broadcast %cst_10 : f32 to vector<8x1024xf32>
    %25 = arith.maximumf %23, %24 : vector<8x1024xf32>
    %c0_11 = arith.constant 0 : index
    %c0_12 = arith.constant 0 : index
    %26 = vector.load %arg5[%c0_11, %c0_12] : memref<1x1024xf32, #tpu.memory_space<vmem>>, vector<1x1024xf32>
    %27 = vector.broadcast %26 : vector<1x1024xf32> to vector<8x1024xf32>
    %28 = arith.mulf %25, %27 : vector<8x1024xf32>
    %cst_13 = arith.constant dense<0.000000e+00> : vector<8xf32>
    %29 = vector.multi_reduction <add>, %28, %cst_13 [1] : vector<8x1024xf32> to vector<8xf32>
    %30 = vector.shape_cast %29 : vector<8xf32> to vector<8x1xf32>
    %c0_14 = arith.constant 0 : index
    %c0_15 = arith.constant 0 : index
    %31 = vector.load %arg6[%c0_14, %c0_15] : memref<1x1xf32, #tpu.memory_space<vmem>>, vector<1x1xf32>
    %32 = vector.broadcast %31 : vector<1x1xf32> to vector<8x1xf32>
    %33 = arith.addf %30, %32 : vector<8x1xf32>
    %cst_16 = arith.constant 0.000000e+00 : f32
    %34 = vector.broadcast %cst_16 : f32 to vector<8x1xf32>
    %35 = arith.subf %34, %33 : vector<8x1xf32>
    %36 = math.exp %35 : vector<8x1xf32>
    %cst_17 = arith.constant 1.000000e+00 : f32
    %37 = vector.broadcast %cst_17 : f32 to vector<8x1xf32>
    %38 = arith.addf %37, %36 : vector<8x1xf32>
    %cst_18 = arith.constant 1.000000e+00 : f32
    %39 = vector.broadcast %cst_18 : f32 to vector<8x1xf32>
    %40 = arith.divf %39, %38 : vector<8x1xf32>
    %c0_19 = arith.constant 0 : index
    %c0_20 = arith.constant 0 : index
    %41 = vector.load %arg7[%c0_19, %c0_20] : memref<8x1xf32, #tpu.memory_space<vmem>>, vector<8x1xf32>
    tpu.vector_store %arg7[%c0_19, %c0_20], %40 {strides = array<i32>} : memref<8x1xf32, #tpu.memory_space<vmem>>, vector<8x1xf32>,
    return
  }
}

</mosaic_0001>

<bundles_post_ra>
// kernel: tpu_custom_call.1
= control target key start
LH: loop header
LB: loop body
LE: loop exit
PB: predicated region body
PF: predicated region fallthrough
CT: control target
= control target key end

     0   :  { %s5211_s0 = inlined_call_operand.vmem [shape: f32[8,2], index: 0, kind: input, shape index: {}]   ;;  %s5212_s1 = inlined_call_operand.hbm [shape: f32[2,1024], index: 1, kind: input, shape index: {}]   ;;  %s5213_s2 = inlined_call_operand.hbm [shape: f32[1,1024], index: 2, kind: input, shape index: {}]   ;;  %s5214_s3 = inlined_call_operand.hbm [shape: bf16[1024,1024], index: 3, kind: input, shape index: {}]   ;;  %s5215_s4 = inlined_call_operand.hbm [shape: f32[1,1024], index: 4, kind: input, shape index: {}]   ;;  %s5216_s5 = inlined_call_operand.hbm [shape: f32[1,1024], index: 5, kind: input, shape index: {}]   ;;  %s5217_s6 = inlined_call_operand.<no memory space> [shape: f32[1,1], index: 6, kind: input, shape index: {}]   ;;  %s5218_s7 = inlined_call_operand.vmem [shape: f32[8,1], index: 7, kind: output, shape index: {}]  }
   0x1   :  { %v12_v0 = vstv %s5217_s6 }
   0x2   :  { %13 = vst [vmem:[#allocation2] sm:$0x1] %v12_v0 }
   0x3   :  { %14 = vsyncpa [#allocation4], 0 }
   0x4   :  { %15 = vsyncpa [#allocation6], 0 }
   0x5   :  { %16 = vsyncpa [#allocation9], 0  ;;  %s4896_s26 = smov [#allocation5]   ;;  %s4897_s28 = smov [#allocation8]  }
   0x6   :  { %s35_s27 = sshll.u32 %s4896_s26, 4  ;;  %s57_s29 = sshll.u32 %s4897_s28, 4  ;;  %s36_s27 = int_to_ptr.vmem [resolvable:$true] %s35_s27  ;;  %s58_s29 = int_to_ptr.vmem [resolvable:$true] %s57_s29 }
   0x7   :  { %s4780_s9 = scalar_lea.hbm %s5213_s2, 128 }
   0x8   :  { %p4781_p0 = scmp.ne.s32.totalorder %s5213_s2, %s4780_s9  ;;  %p4784_p1 = scmp.lt.u32.totalorder %s4780_s9, %s5213_s2 }
   0xa   :  { %p4786_p2 = pnand %p4784_p1, %p4781_p0 }
   0xc   :  { %4789 = shalt.err (!%p4786_p2)
}
   0xd   :  { %s4790_s13 = scalar_lea.vmem %s36_s27, 128  ;;  %p4795_p4 = scmp.lt.s32.totalorder %s36_s27, %s36_s27 }
   0xe   :  { %p4791_p3 = scmp.ne.s32.totalorder %s36_s27, %s4790_s13  ;;  %p4796_p5 = scmp.lt.s32.totalorder %s4790_s13, %s4790_s13 }
  0x10   :  { %p4797_p6 = por %p4796_p5, %p4795_p4 }
  0x12   :  { %p4798_p7 = pnand %p4797_p6, %p4791_p3 }
  0x14   :  { %4801 = shalt.err (!%p4798_p7)
}
  0x15   :  { %38 = dma.hbm_to_vmem [thread:$0]  %s5213_s2, 128, %s36_s27, [#allocation6]  }
  0x16   :  { %s4802_s18 = scalar_lea.hbm %s5215_s4, 128 }
  0x17   :  { %p4803_p8 = scmp.ne.s32.totalorder %s5215_s4, %s4802_s18  ;;  %p4806_p9 = scmp.lt.u32.totalorder %s4802_s18, %s5215_s4 }
  0x19   :  { %p4808_p10 = pnand %p4806_p9, %p4803_p8 }
  0x1b   :  { %4811 = shalt.err (!%p4808_p10)
}
  0x1c   :  { %s4812_s23 = scalar_lea.vmem %s58_s29, 128  ;;  %p4817_p12 = scmp.lt.s32.totalorder %s58_s29, %s58_s29 }
  0x1d   :  { %p4813_p11 = scmp.ne.s32.totalorder %s58_s29, %s4812_s23  ;;  %p4818_p13 = scmp.lt.s32.totalorder %s4812_s23, %s4812_s23 }
  0x1f   :  { %p4819_p0 = por %p4818_p13, %p4817_p12 }
  0x21   :  { %p4820_p1 = pnand %p4819_p0, %p4813_p11 }
  0x23   :  { %4823 = shalt.err (!%p4820_p1)
}
  0x24   :  { %60 = dma.hbm_to_vmem [thread:$0]  %s5215_s4, 128, %s58_s29, [#allocation9]  }
  0x25   :  { %s4898_s25 = smov [#allocation3]   ;;  %s4899_s27 = smov [#allocation7]  }
  0x26   :  { %s25_s26 = sshll.u32 %s4898_s25, 4  ;;  %s44_s28 = sshll.u32 %s4899_s27, 4  ;;  %s26_s26 = int_to_ptr.vmem [resolvable:$true] %s25_s26  ;;  %s4972_s28 = int_to_ptr.vmem [resolvable:$true] %s44_s28 }
  0x27   :  { %s4824_s9 = scalar_lea.hbm %s5212_s1, 256 }
  0x28   :  { %p4825_p2 = scmp.ne.s32.totalorder %s5212_s1, %s4824_s9  ;;  %p4828_p3 = scmp.lt.u32.totalorder %s4824_s9, %s5212_s1 }
  0x2a   :  { %p4830_p4 = pnand %p4828_p3, %p4825_p2 }
  0x2c   :  { %4833 = shalt.err (!%p4830_p4)
}
  0x2d   :  { %s4834_s4 = scalar_lea.vmem %s26_s26, 256  ;;  %p4839_p6 = scmp.lt.s32.totalorder %s26_s26, %s26_s26 }
  0x2e   :  { %p4835_p5 = scmp.ne.s32.totalorder %s26_s26, %s4834_s4  ;;  %p4840_p7 = scmp.lt.s32.totalorder %s4834_s4, %s4834_s4 }
  0x30   :  { %p4841_p8 = por %p4840_p7, %p4839_p6 }
  0x32   :  { %p4842_p9 = pnand %p4841_p8, %p4835_p5 }
  0x34   :  { %4845 = shalt.err (!%p4842_p9)
}
  0x35   :  { %28 = dma.hbm_to_vmem [thread:$0]  %s5212_s1, 256, %s26_s26, [#allocation4]  }
  0x36   :  { %s4846_s16 = scalar_lea.hbm %s5214_s3, 65536 }
  0x37   :  { %p4847_p10 = scmp.ne.s32.totalorder %s5214_s3, %s4846_s16  ;;  %p4850_p11 = scmp.lt.u32.totalorder %s4846_s16, %s5214_s3 }
  0x39   :  { %p4852_p12 = pnand %p4850_p11, %p4847_p10 }
  0x3b   :  { %4855 = shalt.err (!%p4852_p12)
}
  0x3c   :  { %s4856_s21 = scalar_lea.vmem %s4972_s28, 65536  ;;  %p4861_p0 = scmp.lt.s32.totalorder %s4972_s28, %s4972_s28 }
  0x3d   :  { %p4857_p13 = scmp.ne.s32.totalorder %s4972_s28, %s4856_s21  ;;  %p4862_p1 = scmp.lt.s32.totalorder %s4856_s21, %s4856_s21 }
  0x3f   :  { %p4863_p2 = por %p4862_p1, %p4861_p0 }
  0x41   :  { %p4864_p3 = pnand %p4863_p2, %p4857_p13 }
  0x43   :  { %4867 = shalt.err (!%p4864_p3)
}
  0x44   :  { %s4900_s1 = smov 512   ;;  %s4901_s22 = smov 32  }
  0x45   :  { %50 = dma.hbm_to_vmem [thread:$0]  %s5214_s3, 65536, %s4972_s28, [#allocation6], %s4900_s1, %s4900_s1, %s4901_s22  }
  0x46   :  { %s4902_s24 = smov [#allocation10]   ;;  %s4868_s30 = scalar_lea.hbm %s5216_s5, 128 }
  0x47   :  { %s67_s25 = sshll.u32 %s4902_s24, 4  ;;  %p4869_p4 = scmp.ne.s32.totalorder %s5216_s5, %s4868_s30  ;;  %s68_s25 = int_to_ptr.vmem [resolvable:$true] %s67_s25 }
  0x48   :  { %p4872_p5 = scmp.lt.u32.totalorder %s4868_s30, %s5216_s5 }
  0x4a   :  { %p4874_p6 = pnand %p4872_p5, %p4869_p4 }
  0x4c   :  { %4877 = shalt.err (!%p4874_p6)
}
  0x4d   :  { %s4878_s12 = scalar_lea.vmem %s68_s25, 128  ;;  %p4883_p8 = scmp.lt.s32.totalorder %s68_s25, %s68_s25 }
  0x4e   :  { %p4879_p7 = scmp.ne.s32.totalorder %s68_s25, %s4878_s12  ;;  %p4884_p9 = scmp.lt.s32.totalorder %s4878_s12, %s4878_s12 }
  0x50   :  { %p4885_p10 = por %p4884_p9, %p4883_p8 }
  0x52   :  { %p4886_p11 = pnand %p4885_p10, %p4879_p7 }
  0x54   :  { %4889 = shalt.err (!%p4886_p11)
}
  0x55   :  { %70 = dma.hbm_to_vmem [thread:$0]  %s5216_s5, 128, %s68_s25, [#allocation9]  }
  0x56   :  { %4890 = dma.done.wait [#allocation4], 256  }
  0x57   :  { %4891 = vsyncadd [#allocation4], 4294967040 }
  0x58   :  { %4892 = dma.done.wait [#allocation6], 65664  }
  0x59   :  { %4893 = vsyncadd [#allocation6], 4294901632 }
  0x5a   :  { %4894 = dma.done.wait [#allocation9], 256  }
  0x5b   :  { %4895 = vsyncadd [#allocation9], 4294967040  ;;  %v4903_v1 = vmov 0   ;;  %v88_v2 = vld [vmem:[%s5211_s0] sm:$0xff]  ;;  %v4904_v22 = vmov 1   ;;  %vm4187_vm0 = vcmask 7168  }
  0x5c   :  { %4774 = vset.pattern.permute.xlu0 %v4903_v1  ;;  %v336_v3 = vld [vmem:[#allocation7] sm:$0xff]  ;;  %v337_v6 = vld [vmem:[#allocation7 + $0x8] sm:$0xff] }
  0x5d   :  { %v340_v4 = vld [vmem:[#allocation7 + $0x20] sm:$0xff]  ;;  %93 = vperm.xlu0 %4774, %v88_v2   ;;  %v341_v7 = vld [vmem:[#allocation7 + $0x28] sm:$0xff] }
  0x5e   :  { %v4197_v5 = vcombine.high %v336_v3, %v340_v4  ;;  %v4196_v8 = vcombine.low %v336_v3, %v340_v4  ;;  %v344_v9 = vld [vmem:[#allocation7 + $0x40] sm:$0xff]  ;;  %v4199_v10 = vcombine.high %v337_v6, %v341_v7  ;;  %v4198_v11 = vcombine.low %v337_v6, %v341_v7  ;;  %v345_v13 = vld [vmem:[#allocation7 + $0x48] sm:$0xff] }
  0x5f   :  { %v348_v12 = vld [vmem:[#allocation7 + $0x60] sm:$0xff]  ;;  %v349_v14 = vld [vmem:[#allocation7 + $0x68] sm:$0xff] }
  0x60   :  { %3450 = vmatprep.subr.bf16.mxu0 %v4197_v5  ;;  %v4205_v15 = vcombine.high %v344_v9, %v348_v12  ;;  %v4207_v16 = vcombine.high %v345_v13, %v349_v14  ;;  %v352_v17 = vld [vmem:[#allocation7 + $0x80] sm:$0xff]  ;;  %v353_v19 = vld [vmem:[#allocation7 + $0x88] sm:$0xff]  ;;  %3614 = vmatprep.subr.bf16.mxu1 %v4199_v10  ;;  %v4204_v20 = vcombine.low %v344_v9, %v348_v12 }
  0x61   :  { %v356_v18 = vld [vmem:[#allocation7 + $0xa0] sm:$0xff]  ;;  %3451 = vmatpush1.bf16.msra.mxu0 %v4196_v8  ;;  %v357_v21 = vld [vmem:[#allocation7 + $0xa8] sm:$0xff]  ;;  %4775 = vset.pattern.permute.xlu0 %v4904_v22  ;;  %v4206_v23 = vcombine.low %v345_v13, %v349_v14 }
  0x62   :  { %3615 = vmatpush1.bf16.msra.mxu1 %v4198_v11  ;;  %v4213_v24 = vcombine.high %v352_v17, %v356_v18  ;;  %179 = vperm.xlu0 %4775, %v88_v2   ;;  %v4215_v25 = vcombine.high %v353_v19, %v357_v21  ;;  %v360_v26 = vld [vmem:[#allocation7 + $0xc0] sm:$0xff]  ;;  %v361_v28 = vld [vmem:[#allocation7 + $0xc8] sm:$0xff]  ;;  %v4212_v30 = vcombine.low %v352_v17, %v356_v18 }
  0x63   :  { %3452 = vmatprep.subr.bf16.mxu0 %v4205_v15  ;;  %v364_v27 = vld [vmem:[#allocation7 + $0xe0] sm:$0xff]  ;;  %3616 = vmatprep.subr.bf16.mxu1 %v4207_v16  ;;  %v365_v29 = vld [vmem:[#allocation7 + $0xe8] sm:$0xff]  ;;  %v4214_v31 = vcombine.low %v353_v19, %v357_v21 }
  0x64   :  { %v4221_v32 = vcombine.high %v360_v26, %v364_v27  ;;  %v4223_v33 = vcombine.high %v361_v28, %v365_v29  ;;  %v368_v34 = vld [vmem:[#allocation7 + $0x100] sm:$0xff]  ;;  %v369_v36 = vld [vmem:[#allocation7 + $0x108] sm:$0xff]  ;;  %v4220_v38 = vcombine.low %v360_v26, %v364_v27  ;;  %v4222_v39 = vcombine.low %v361_v28, %v365_v29 }
  0x65   :  { %3453 = vmatpush1.bf16.msra.mxu0 %v4204_v20  ;;  %v372_v35 = vld [vmem:[#allocation7 + $0x120] sm:$0xff]  ;;  %v373_v37 = vld [vmem:[#allocation7 + $0x128] sm:$0xff] }
  0x66   :  { %3617 = vmatpush1.bf16.msra.mxu1 %v4206_v23  ;;  %3454 = vmatprep.subr.bf16.mxu0 %v4213_v24  ;;  %v4229_v40 = vcombine.high %v368_v34, %v372_v35  ;;  %v4231_v41 = vcombine.high %v369_v36, %v373_v37  ;;  %v376_v42 = vld [vmem:[#allocation7 + $0x140] sm:$0xff]  ;;  %v377_v44 = vld [vmem:[#allocation7 + $0x148] sm:$0xff]  ;;  %v4228_v46 = vcombine.low %v368_v34, %v372_v35 }
  0x67   :  { %3618 = vmatprep.subr.bf16.mxu1 %v4215_v25  ;;  %v380_v43 = vld [vmem:[#allocation7 + $0x160] sm:$0xff]  ;;  %v381_v45 = vld [vmem:[#allocation7 + $0x168] sm:$0xff]  ;;  %v4230_v47 = vcombine.low %v369_v36, %v373_v37 }
  0x68   :  { %v4237_v48 = vcombine.high %v376_v42, %v380_v43  ;;  %v4239_v49 = vcombine.high %v377_v44, %v381_v45  ;;  %v384_v50 = vld [vmem:[#allocation7 + $0x180] sm:$0xff]  ;;  %v385_v52 = vld [vmem:[#allocation7 + $0x188] sm:$0xff]  ;;  %v4236_v54 = vcombine.low %v376_v42, %v380_v43  ;;  %v4238_v55 = vcombine.low %v377_v44, %v381_v45 }
  0x69   :  { %3455 = vmatpush1.bf16.msra.mxu0 %v4212_v30  ;;  %v388_v51 = vld [vmem:[#allocation7 + $0x1a0] sm:$0xff]  ;;  %v389_v53 = vld [vmem:[#allocation7 + $0x1a8] sm:$0xff] }
  0x6a   :  { %3619 = vmatpush1.bf16.msra.mxu1 %v4214_v31  ;;  %3456 = vmatprep.subr.bf16.mxu0 %v4221_v32  ;;  %v4245_v56 = vcombine.high %v384_v50, %v388_v51  ;;  %v392_v57 = vld [vmem:[#allocation7 + $0x1c0] sm:$0xff]  ;;  %v4247_v59 = vcombine.high %v385_v52, %v389_v53  ;;  %v393_v60 = vld [vmem:[#allocation7 + $0x1c8] sm:$0xff]  ;;  %v4244_v3 = vcombine.low %v384_v50, %v388_v51 }
  0x6b   :  { %3620 = vmatprep.subr.bf16.mxu1 %v4223_v33  ;;  %v396_v58 = vld [vmem:[#allocation7 + $0x1e0] sm:$0xff]  ;;  %v397_v63 = vld [vmem:[#allocation7 + $0x1e8] sm:$0xff]  ;;  %v4246_v5 = vcombine.low %v385_v52, %v389_v53 }
  0x6c   :  { %v5018_v61 = vld [vmem:[#allocation7 + $0x400] sm:$0xff]  ;;  %v5024_v1 = vld [vmem:[#allocation7 + $0x408] sm:$0xff]  ;;  %v4253_v6 = vcombine.high %v392_v57, %v396_v58  ;;  %v4255_v7 = vcombine.high %v393_v60, %v397_v63  ;;  %v4252_v12 = vcombine.low %v392_v57, %v396_v58  ;;  %v4254_v13 = vcombine.low %v393_v60, %v397_v63 }
  0x6d   :  { %3457 = vmatpush1.bf16.msra.mxu0 %v4220_v38  ;;  %v5020_v62 = vld [vmem:[#allocation7 + $0x420] sm:$0xff]  ;;  %v5026_v2 = vld [vmem:[#allocation7 + $0x428] sm:$0xff] }
  0x6e   :  { %3621 = vmatpush1.bf16.msra.mxu1 %v4222_v39  ;;  %3458 = vmatprep.subr.bf16.mxu0 %v4229_v40  ;;  %v4324_v0 = vcombine.low %v5018_v61, %v5020_v62  ;;  %v4326_v4 = vcombine.low %v5024_v1, %v5026_v2  ;;  %v400_v8 = vld [vmem:[#allocation7 + $0x200] sm:$0xff]  ;;  %v401_v10 = vld [vmem:[#allocation7 + $0x208] sm:$0xff] }
  0x6f   :  { %3622 = vmatprep.subr.bf16.mxu1 %v4231_v41  ;;  %v404_v9 = vld [vmem:[#allocation7 + $0x220] sm:$0xff]  ;;  %v405_v11 = vld [vmem:[#allocation7 + $0x228] sm:$0xff] }
  0x70   :  { %v4261_v14 = vcombine.high %v400_v8, %v404_v9  ;;  %v4263_v15 = vcombine.high %v401_v10, %v405_v11  ;;  %v408_v16 = vld [vmem:[#allocation7 + $0x240] sm:$0xff]  ;;  %v409_v18 = vld [vmem:[#allocation7 + $0x248] sm:$0xff]  ;;  %v4260_v20 = vcombine.low %v400_v8, %v404_v9  ;;  %v4262_v21 = vcombine.low %v401_v10, %v405_v11 }
  0x71   :  { %3459 = vmatpush1.bf16.msra.mxu0 %v4228_v46  ;;  %v412_v17 = vld [vmem:[#allocation7 + $0x260] sm:$0xff]  ;;  %v413_v19 = vld [vmem:[#allocation7 + $0x268] sm:$0xff] }
  0x72   :  { %3623 = vmatpush1.bf16.msra.mxu1 %v4230_v47  ;;  %3460 = vmatprep.subr.bf16.mxu0 %v4237_v48  ;;  %v4269_v22 = vcombine.high %v408_v16, %v412_v17  ;;  %v4271_v23 = vcombine.high %v409_v18, %v413_v19  ;;  %v416_v24 = vld [vmem:[#allocation7 + $0x280] sm:$0xff]  ;;  %v417_v26 = vld [vmem:[#allocation7 + $0x288] sm:$0xff]  ;;  %v4268_v28 = vcombine.low %v408_v16, %v412_v17 }
  0x73   :  { %3624 = vmatprep.subr.bf16.mxu1 %v4239_v49  ;;  %v420_v25 = vld [vmem:[#allocation7 + $0x2a0] sm:$0xff]  ;;  %v421_v27 = vld [vmem:[#allocation7 + $0x2a8] sm:$0xff]  ;;  %v4270_v29 = vcombine.low %v409_v18, %v413_v19  ;;  %v4325_v16 = vcombine.high %v5018_v61, %v5020_v62  ;;  %v4327_v17 = vcombine.high %v5024_v1, %v5026_v2  ;;  %v98_v18 = vlaneseq }
  0x74   :  { %v4277_v30 = vcombine.high %v416_v24, %v420_v25  ;;  %v4279_v31 = vcombine.high %v417_v26, %v421_v27  ;;  %v424_v32 = vld [vmem:[#allocation7 + $0x2c0] sm:$0xff]  ;;  %v425_v34 = vld [vmem:[#allocation7 + $0x2c8] sm:$0xff]  ;;  %v4276_v36 = vcombine.low %v416_v24, %v420_v25  ;;  %v4278_v37 = vcombine.low %v417_v26, %v421_v27  ;;  %v90_v27 = vld [vmem:[#allocation3 + $0x8] sm:$0xff] }
  0x75   :  { %3461 = vmatpush1.bf16.msra.mxu0 %v4236_v54  ;;  %v428_v33 = vld [vmem:[#allocation7 + $0x2e0] sm:$0xff]  ;;  %v429_v35 = vld [vmem:[#allocation7 + $0x2e8] sm:$0xff]  ;;  %v99_v19 = vshrl.u32 %v98_v18, 7 }
  0x76   :  { %3625 = vmatpush1.bf16.msra.mxu1 %v4238_v55  ;;  %3462 = vmatprep.subr.bf16.mxu0 %v4245_v56  ;;  %v4285_v38 = vcombine.high %v424_v32, %v428_v33  ;;  %v4287_v39 = vcombine.high %v425_v34, %v429_v35  ;;  %v432_v40 = vld [vmem:[#allocation7 + $0x300] sm:$0xff]  ;;  %v433_v42 = vld [vmem:[#allocation7 + $0x308] sm:$0xff]  ;;  %v4284_v44 = vcombine.low %v424_v32, %v428_v33 }
  0x77   :  { %3626 = vmatprep.subr.bf16.mxu1 %v4247_v59  ;;  %v436_v41 = vld [vmem:[#allocation7 + $0x320] sm:$0xff]  ;;  %v437_v43 = vld [vmem:[#allocation7 + $0x328] sm:$0xff]  ;;  %v4286_v45 = vcombine.low %v425_v34, %v429_v35  ;;  %v5040_v24 = vsub.s32 0, %v99_v19  ;;  %v5043_v26 = vsub.s32 3, %v99_v19  ;;  %v5052_v32 = vsub.s32 5, %v99_v19 }
  0x78   :  { %v4293_v46 = vcombine.high %v432_v40, %v436_v41  ;;  %v4295_v47 = vcombine.high %v433_v42, %v437_v43  ;;  %v440_v48 = vld [vmem:[#allocation7 + $0x340] sm:$0xff]  ;;  %v441_v50 = vld [vmem:[#allocation7 + $0x348] sm:$0xff]  ;;  %v4292_v52 = vcombine.low %v432_v40, %v436_v41  ;;  %v4294_v53 = vcombine.low %v433_v42, %v437_v43 }
  0x79   :  { %3463 = vmatpush1.bf16.msra.mxu0 %v4244_v3  ;;  %v444_v49 = vld [vmem:[#allocation7 + $0x360] sm:$0xff]  ;;  %v445_v51 = vld [vmem:[#allocation7 + $0x368] sm:$0xff] }
  0x7a   :  { %3627 = vmatpush1.bf16.msra.mxu1 %v4246_v5  ;;  %3464 = vmatprep.subr.bf16.mxu0 %v4253_v6  ;;  %v4301_v54 = vcombine.high %v440_v48, %v444_v49  ;;  %v4303_v55 = vcombine.high %v441_v50, %v445_v51  ;;  %v448_v56 = vld [vmem:[#allocation7 + $0x380] sm:$0xff]  ;;  %v449_v58 = vld [vmem:[#allocation7 + $0x388] sm:$0xff]  ;;  %v4300_v60 = vcombine.low %v440_v48, %v444_v49 }
  0x7b   :  { %3628 = vmatprep.subr.bf16.mxu1 %v4255_v7  ;;  %v452_v57 = vld [vmem:[#allocation7 + $0x3a0] sm:$0xff]  ;;  %v453_v59 = vld [vmem:[#allocation7 + $0x3a8] sm:$0xff]  ;;  %v4302_v63 = vcombine.low %v441_v50, %v445_v51  ;;  %v209_v50 = vrot.slane %v90_v27, %v5052_v32 }
  0x7c   :  { %v4309_v3 = vcombine.high %v448_v56, %v452_v57  ;;  %v4311_v5 = vcombine.high %v449_v58, %v453_v59  ;;  %v456_v6 = vld [vmem:[#allocation7 + $0x3c0] sm:$0xff]  ;;  %v457_v8 = vld [vmem:[#allocation7 + $0x3c8] sm:$0xff]  ;;  %v4308_v10 = vcombine.low %v448_v56, %v452_v57  ;;  %v4310_v11 = vcombine.low %v449_v58, %v453_v59 }
  0x7d   :  { %3465 = vmatpush1.bf16.msra.mxu0 %v4252_v12  ;;  %v460_v7 = vld [vmem:[#allocation7 + $0x3e0] sm:$0xff]  ;;  %v461_v9 = vld [vmem:[#allocation7 + $0x3e8] sm:$0xff] }
  0x7e   :  { %3629 = vmatpush1.bf16.msra.mxu1 %v4254_v13  ;;  %3466 = vmatprep.subr.bf16.mxu0 %v4261_v14  ;;  %v4317_v12 = vcombine.high %v456_v6, %v460_v7  ;;  %v4319_v13 = vcombine.high %v457_v8, %v461_v9  ;;  %v4316_v14 = vcombine.low %v456_v6, %v460_v7  ;;  %v489_v61 = vld [vmem:[#allocation7 + $0x4c8] sm:$0xff] }
  0x7f   :  { %3630 = vmatprep.subr.bf16.mxu1 %v4263_v15  ;;  %v4318_v15 = vcombine.low %v457_v8, %v461_v9  ;;  %v493_v62 = vld [vmem:[#allocation7 + $0x4e8] sm:$0xff] }
  0x81   :  { %3467 = vmatpush1.bf16.msra.mxu0 %v4260_v20  ;;  %v5034_v20 = vsub.s32 2, %v99_v19 }
  0x82   :  { %3631 = vmatpush1.bf16.msra.mxu1 %v4262_v21  ;;  %3468 = vmatprep.subr.bf16.mxu0 %v4269_v22  ;;  %v89_v21 = vld [vmem:[#allocation3] sm:$0xff]  ;;  %v5036_v22 = vsub.s32 4, %v99_v19 }
  0x83   :  { %3632 = vmatprep.subr.bf16.mxu1 %v4271_v23  ;;  %v5038_v23 = vsub.s32 6, %v99_v19  ;;  %v105_v25 = vrot.slane %v89_v21, %v5034_v20  ;;  %v121_v42 = vrot.slane %v90_v27, %v5034_v20 }
  0x84   :  { %v125_v34 = vrot.slane %v90_v27, %v5036_v22 }
  0x85   :  { %3469 = vmatpush1.bf16.msra.mxu0 %v4268_v28  ;;  %v5045_v28 = vsub.s32 1, %v99_v19  ;;  %v129_v33 = vrot.slane %v90_v27, %v5038_v23  ;;  %v145_v35 = vrot.slane %v105_v25, %v5040_v24  ;;  %v113_v40 = vrot.slane %v89_v21, %v5038_v23 }
  0x86   :  { %3633 = vmatpush1.bf16.msra.mxu1 %v4270_v29  ;;  %3470 = vmatprep.subr.bf16.mxu0 %v4277_v30  ;;  %v5047_v29 = vld [vmem:[#allocation5] sm:$0xff]  ;;  %v109_v30 = vrot.slane %v89_v21, %v5036_v22  ;;  %v165_v49 = vrot.slane %v125_v34, %v5040_v24  ;;  %v161_v59 = vrot.slane %v121_v42, %v5040_v24 }
  0x87   :  { %3634 = vmatprep.subr.bf16.mxu1 %v4279_v31  ;;  %v5050_v31 = vsub.s32 7, %v99_v19  ;;  %v153_v57 = vrot.slane %v113_v40, %v5040_v24  ;;  %v249_v9 = vrot.slane %v209_v50, %v5045_v28 }
  0x88   :  { %v149_v41 = vrot.slane %v109_v30, %v5040_v24 }
  0x89   :  { %3471 = vmatpush1.bf16.msra.mxu0 %v4276_v36  ;;  %v189_v36 = vrot.slane %v89_v21, %v5043_v26  ;;  %v197_v43 = vrot.slane %v89_v21, %v5050_v31  ;;  %v213_v48 = vrot.slane %v90_v27, %v5050_v31 }
  0x8a   :  { %3635 = vmatpush1.bf16.msra.mxu1 %v4278_v37  ;;  %3472 = vmatprep.subr.bf16.mxu0 %v4285_v38  ;;  %v279_v37 = vrot.slane %v5047_v29, %v5045_v28  ;;  %v101_v38 = vrot.slane %v89_v21, %v5040_v24 }
  0x8b   :  { %3636 = vmatprep.subr.bf16.mxu1 %v4287_v39  ;;  %v185_v39 = vrot.slane %v89_v21, %v5045_v28  ;;  %v253_v7 = vrot.slane %v213_v48, %v5045_v28 }
  0x8d   :  { %3473 = vmatpush1.bf16.msra.mxu0 %v4284_v44  ;;  %v193_v44 = vrot.slane %v89_v21, %v5052_v32  ;;  %v225_v56 = vrot.slane %v185_v39, %v5045_v28 }
  0x8e   :  { %3637 = vmatpush1.bf16.msra.mxu1 %v4286_v45  ;;  %3474 = vmatprep.subr.bf16.mxu0 %v4293_v46  ;;  %v205_v45 = vrot.slane %v90_v27, %v5043_v26  ;;  %v201_v46 = vrot.slane %v90_v27, %v5045_v28 }
  0x8f   :  { %3638 = vmatprep.subr.bf16.mxu1 %v4295_v47  ;;  %v169_v47 = vrot.slane %v129_v33, %v5040_v24 }
  0x91   :  { %3475 = vmatpush1.bf16.msra.mxu0 %v4292_v52  ;;  %v229_v52 = vrot.slane %v189_v36, %v5045_v28 }
  0x92   :  { %3639 = vmatpush1.bf16.msra.mxu1 %v4294_v53  ;;  %3476 = vmatprep.subr.bf16.mxu0 %v4301_v54  ;;  %v141_v53 = vrot.slane %v101_v38, %v5040_v24  ;;  %v275_v54 = vrot.slane %v5047_v29, %v5040_v24 }
  0x93   :  { %3640 = vmatprep.subr.bf16.mxu1 %v4303_v55  ;;  %v117_v55 = vrot.slane %v90_v27, %v5040_v24 }
  0x95   :  { %3477 = vmatpush1.bf16.msra.mxu0 %v4300_v60  ;;  %v237_v60 = vrot.slane %v197_v43, %v5045_v28 }
  0x96   :  { %3641 = vmatpush1.bf16.msra.mxu1 %v4302_v63  ;;  %3478 = vmatprep.subr.bf16.mxu0 %v4309_v3  ;;  %v233_v63 = vrot.slane %v193_v44, %v5045_v28  ;;  %v245_v3 = vrot.slane %v205_v45, %v5045_v28 }
  0x97   :  { %3642 = vmatprep.subr.bf16.mxu1 %v4311_v5  ;;  %v241_v5 = vrot.slane %v201_v46, %v5045_v28 }
  0x99   :  { %3479 = vmatpush1.bf16.msra.mxu0 %v4308_v10  ;;  %v287_v10 = vrot.slane %v5047_v29, %v5043_v26 }
  0x9a   :  { %3643 = vmatpush1.bf16.msra.mxu1 %v4310_v11  ;;  %3480 = vmatprep.subr.bf16.mxu0 %v4317_v12  ;;  %v283_v11 = vrot.slane %v5047_v29, %v5034_v20  ;;  %v295_v12 = vrot.slane %v5047_v29, %v5052_v32 }
  0x9b   :  { %3644 = vmatprep.subr.bf16.mxu1 %v4319_v13  ;;  %v157_v13 = vrot.slane %v117_v55, %v5040_v24 }
  0x9d   :  { %3481 = vmatpush1.bf16.msra.mxu0 %v4316_v14 }
  0x9e   :  { %3645 = vmatpush1.bf16.msra.mxu1 %v4318_v15  ;;  %3491 = vmatprep.subr.bf16.mxu0 %v4325_v16 }
  0x9f   :  { %3655 = vmatprep.subr.bf16.mxu1 %v4327_v17 }
  0xdc   :  { %v94_v51 = vpop.permute.xlu0 %93 }
  0xdd   :  { %v172_v58 = vmul.f32 %v149_v41, %v94_v51  ;;  %v177_v6 = vmul.f32 %v169_v47, %v94_v51  ;;  %v176_v8 = vmul.f32 %v165_v49, %v94_v51  ;;  %v171_v15 = vmul.f32 %v145_v35, %v94_v51 }
  0xde   :  { %v170_v16 = vmul.f32 %v141_v53, %v94_v51  ;;  %v173_v17 = vmul.f32 %v153_v57, %v94_v51  ;;  %v175_v18 = vmul.f32 %v161_v59, %v94_v51  ;;  %v174_v43 = vmul.f32 %v157_v13, %v94_v51  ;;  %v476_v51 = vld [vmem:[#allocation7 + $0x460] sm:$0xff]  ;;  %v477_v59 = vld [vmem:[#allocation7 + $0x468] sm:$0xff] }
  0xdf   :  { %v291_v35 = vrot.slane %v5047_v29, %v5036_v22 }
  0xe1   :  { %v180_v14 = vpop.permute.xlu0 %179 }
  0xe2   :  { %v255_v19 = vmul.f32 %v229_v52, %v180_v14  ;;  %v254_v21 = vmul.f32 %v225_v56, %v180_v14  ;;  %v257_v25 = vmul.f32 %v237_v60, %v180_v14  ;;  %v256_v27 = vmul.f32 %v233_v63, %v180_v14  ;;  %v472_v56 = vld [vmem:[#allocation7 + $0x440] sm:$0xff] }
  0xe3   :  { %v259_v30 = vmul.f32 %v245_v3, %v180_v14  ;;  %v258_v33 = vmul.f32 %v241_v5, %v180_v14  ;;  %v261_v34 = vmul.f32 %v253_v7, %v180_v14  ;;  %v260_v36 = vmul.f32 %v249_v9, %v180_v14  ;;  %v480_v63 = vld [vmem:[#allocation7 + $0x480] sm:$0xff] }
  0xe4   :  { %v263_v38 = vadd.f32 %v255_v19, %v171_v15  ;;  %v262_v39 = vadd.f32 %v254_v21, %v170_v16  ;;  %v265_v40 = vadd.f32 %v257_v25, %v173_v17  ;;  %v264_v41 = vadd.f32 %v256_v27, %v172_v58  ;;  %v473_v58 = vld [vmem:[#allocation7 + $0x448] sm:$0xff]  ;;  %v484_v9 = vld [vmem:[#allocation7 + $0x4a0] sm:$0xff] }
  0xe5   :  { %v267_v42 = vadd.f32 %v259_v30, %v175_v18  ;;  %v266_v49 = vadd.f32 %v258_v33, %v174_v43  ;;  %v269_v50 = vadd.f32 %v261_v34, %v177_v6  ;;  %v303_v52 = vrot.slane %v5047_v29, %v5050_v31  ;;  %v488_v17 = vld [vmem:[#allocation7 + $0x4c0] sm:$0xff]  ;;  %v497_v25 = vld [vmem:[#allocation7 + $0x508] sm:$0xff] }
  0xe6   :  { %v313_v44 = vadd.f32 %v279_v37, %v263_v38  ;;  %v312_v45 = vadd.f32 %v275_v54, %v262_v39  ;;  %v315_v46 = vadd.f32 %v287_v10, %v265_v40  ;;  %v5096_v47 = vadd.f32 %v283_v11, %v264_v41  ;;  %v481_v10 = vld [vmem:[#allocation7 + $0x488] sm:$0xff]  ;;  %v492_v18 = vld [vmem:[#allocation7 + $0x4e0] sm:$0xff] }
  0xe7   :  { %v5098_v48 = vadd.f32 %v295_v12, %v267_v42  ;;  %v299_v54 = vrot.slane %v5047_v29, %v5038_v23  ;;  %v5108_v3 = vadd.f32 %v291_v35, %v266_v49  ;;  %v5110_v5 = vadd.f32 %v303_v52, %v269_v50  ;;  %v485_v11 = vld [vmem:[#allocation7 + $0x4a8] sm:$0xff]  ;;  %v496_v19 = vld [vmem:[#allocation7 + $0x500] sm:$0xff] }
  0xe8   :  { %v321_v53 = vmax.f32 %v313_v44, 0.0  ;;  %v320_v55 = vmax.f32 %v312_v45, 0.0  ;;  %v323_v57 = vmax.f32 %v315_v46, 0.0  ;;  %v4333_v6 = vcombine.high %v472_v56, %v476_v51  ;;  %v500_v21 = vld [vmem:[#allocation7 + $0x520] sm:$0xff]  ;;  %v501_v27 = vld [vmem:[#allocation7 + $0x528] sm:$0xff] }
  0xe9   :  { %v4335_v7 = vcombine.high %v473_v58, %v477_v59  ;;  %v268_v12 = vadd.f32 %v260_v36, %v176_v8  ;;  %v4332_v13 = vcombine.low %v472_v56, %v476_v51  ;;  %v4334_v14 = vcombine.low %v473_v58, %v477_v59  ;;  %v504_v38 = vld [vmem:[#allocation7 + $0x540] sm:$0xff]  ;;  %v505_v40 = vld [vmem:[#allocation7 + $0x548] sm:$0xff] }
  0xea   :  { %v5102_v60 = vpack.c.bf16 %v321_v53, %v321_v53  ;;  %v5104_v37 = vpack.c.bf16 %v320_v55, %v320_v55  ;;  %v5116_v29 = vpack.c.bf16 %v323_v57, %v323_v57  ;;  %v4341_v8 = vcombine.high %v480_v63, %v484_v9  ;;  %v508_v39 = vld [vmem:[#allocation7 + $0x560] sm:$0xff]  ;;  %v509_v41 = vld [vmem:[#allocation7 + $0x568] sm:$0xff] }
  0xeb   :  { %v5124_v15 = vadd.f32 %v299_v54, %v268_v12  ;;  %v4343_v16 = vcombine.high %v481_v10, %v485_v11  ;;  %v4342_v1 = vcombine.low %v481_v10, %v485_v11  ;;  %v4349_v2 = vcombine.high %v488_v17, %v492_v18  ;;  %v512_v45 = vld [vmem:[#allocation7 + $0x580] sm:$0xff]  ;;  %v513_v49 = vld [vmem:[#allocation7 + $0x588] sm:$0xff] }
  0xec   :  { %3482 = vmatprep.mubr.bf16.mxu0 %v5102_v60  ;;  %3646 = vmatprep.mubr.bf16.mxu1 %v5102_v60  ;;  %v4348_v30 = vcombine.low %v488_v17, %v492_v18  ;;  %v4350_v33 = vcombine.low %v489_v61, %v493_v62  ;;  %v4357_v34 = vcombine.high %v496_v19, %v500_v21  ;;  %v516_v46 = vld [vmem:[#allocation7 + $0x5a0] sm:$0xff]  ;;  %v517_v50 = vld [vmem:[#allocation7 + $0x5a8] sm:$0xff] }
  0xed   :  { %3483 = vmatmul.mubr.bf16.vlgmr.msra.gmra.mrb[0].mxu0 %v5104_v37  ;;  %3647 = vmatmul.mubr.bf16.vlgmr.msra.gmra.mrb[0].mxu1 %v5104_v37  ;;  %v4359_v36 = vcombine.high %v497_v25, %v501_v27  ;;  %v4356_v42 = vcombine.low %v496_v19, %v500_v21  ;;  %v4358_v43 = vcombine.low %v497_v25, %v501_v27  ;;  %v520_v57 = vld [vmem:[#allocation7 + $0x5c0] sm:$0xff]  ;;  %v521_v58 = vld [vmem:[#allocation7 + $0x5c8] sm:$0xff] }
  0xee   :  { %3492 = vmatpush1.bf16.msra.mxu0 %v4324_v0  ;;  %3656 = vmatpush1.bf16.msra.mxu1 %v4326_v4  ;;  %v4340_v0 = vcombine.low %v480_v63, %v484_v9  ;;  %v4351_v4 = vcombine.high %v489_v61, %v493_v62  ;;  %v4365_v35 = vcombine.high %v504_v38, %v508_v39  ;;  %v524_v51 = vld [vmem:[#allocation7 + $0x5e0] sm:$0xff]  ;;  %v525_v59 = vld [vmem:[#allocation7 + $0x5e8] sm:$0xff] }
  0xef   :  { %3523 = vmatprep.mubr.bf16.mxu0 %v5116_v29  ;;  %3687 = vmatprep.mubr.bf16.mxu1 %v5116_v29  ;;  %v4367_v44 = vcombine.high %v505_v40, %v509_v41  ;;  %v4364_v52 = vcombine.low %v504_v38, %v508_v39  ;;  %v4366_v53 = vcombine.low %v505_v40, %v509_v41  ;;  %v528_v9 = vld [vmem:[#allocation7 + $0x600] sm:$0xff]  ;;  %v529_v11 = vld [vmem:[#allocation7 + $0x608] sm:$0xff] }
  0xf0   :  { %3493 = vmatprep.subr.bf16.mxu0 %v4333_v6  ;;  %3657 = vmatprep.subr.bf16.mxu1 %v4335_v7  ;;  %v4373_v55 = vcombine.high %v512_v45, %v516_v46  ;;  %v4375_v56 = vcombine.high %v513_v49, %v517_v50  ;;  %v4372_v54 = vcombine.low %v512_v45, %v516_v46  ;;  %v532_v10 = vld [vmem:[#allocation7 + $0x620] sm:$0xff]  ;;  %v533_v12 = vld [vmem:[#allocation7 + $0x628] sm:$0xff] }
  0xf1   :  { %v4374_v63 = vcombine.low %v513_v49, %v517_v50  ;;  %v4381_v6 = vcombine.high %v520_v57, %v524_v51  ;;  %v4383_v7 = vcombine.high %v521_v58, %v525_v59  ;;  %v536_v17 = vld [vmem:[#allocation7 + $0x640] sm:$0xff]  ;;  %v537_v61 = vld [vmem:[#allocation7 + $0x648] sm:$0xff] }
  0xf2   :  { %3494 = vmatpush1.bf16.msra.mxu0 %v4332_v13  ;;  %3658 = vmatpush1.bf16.msra.mxu1 %v4334_v14  ;;  %v4380_v13 = vcombine.low %v520_v57, %v524_v51  ;;  %v4382_v14 = vcombine.low %v521_v58, %v525_v59  ;;  %v540_v18 = vld [vmem:[#allocation7 + $0x660] sm:$0xff]  ;;  %v541_v62 = vld [vmem:[#allocation7 + $0x668] sm:$0xff] }
  0xf3   :  { %3495 = vmatprep.subr.bf16.mxu0 %v4341_v8  ;;  %3659 = vmatprep.subr.bf16.mxu1 %v4343_v16  ;;  %v4389_v8 = vcombine.high %v528_v9, %v532_v10  ;;  %v4391_v16 = vcombine.high %v529_v11, %v533_v12  ;;  %v544_v19 = vld [vmem:[#allocation7 + $0x680] sm:$0xff]  ;;  %v545_v25 = vld [vmem:[#allocation7 + $0x688] sm:$0xff] }
  0xf4   :  { %v548_v21 = vld [vmem:[#allocation7 + $0x6a0] sm:$0xff]  ;;  %v549_v27 = vld [vmem:[#allocation7 + $0x6a8] sm:$0xff] }
  0xf5   :  { %v552_v38 = vld [vmem:[#allocation7 + $0x6c0] sm:$0xff]  ;;  %v553_v40 = vld [vmem:[#allocation7 + $0x6c8] sm:$0xff] }
  0xf6   :  { %3496 = vmatpush1.bf16.msra.mxu0 %v4340_v0  ;;  %3660 = vmatpush1.bf16.msra.mxu1 %v4342_v1  ;;  %v4388_v0 = vcombine.low %v528_v9, %v532_v10  ;;  %v4390_v1 = vcombine.low %v529_v11, %v533_v12  ;;  %v556_v39 = vld [vmem:[#allocation7 + $0x6e0] sm:$0xff]  ;;  %v557_v41 = vld [vmem:[#allocation7 + $0x6e8] sm:$0xff] }
  0xf7   :  { %3497 = vmatprep.subr.bf16.mxu0 %v4349_v2  ;;  %3661 = vmatprep.subr.bf16.mxu1 %v4351_v4  ;;  %v4397_v2 = vcombine.high %v536_v17, %v540_v18  ;;  %v4399_v4 = vcombine.high %v537_v61, %v541_v62  ;;  %v560_v45 = vld [vmem:[#allocation7 + $0x700] sm:$0xff]  ;;  %v561_v49 = vld [vmem:[#allocation7 + $0x708] sm:$0xff] }
  0xf8   :  { %v564_v46 = vld [vmem:[#allocation7 + $0x720] sm:$0xff]  ;;  %v565_v50 = vld [vmem:[#allocation7 + $0x728] sm:$0xff] }
  0xf9   :  { %v568_v57 = vld [vmem:[#allocation7 + $0x740] sm:$0xff]  ;;  %v569_v58 = vld [vmem:[#allocation7 + $0x748] sm:$0xff] }
  0xfa   :  { %3498 = vmatpush1.bf16.msra.mxu0 %v4348_v30  ;;  %3662 = vmatpush1.bf16.msra.mxu1 %v4350_v33  ;;  %v4396_v30 = vcombine.low %v536_v17, %v540_v18  ;;  %v4398_v33 = vcombine.low %v537_v61, %v541_v62  ;;  %v572_v51 = vld [vmem:[#allocation7 + $0x760] sm:$0xff]  ;;  %v573_v59 = vld [vmem:[#allocation7 + $0x768] sm:$0xff] }
  0xfb   :  { %3499 = vmatprep.subr.bf16.mxu0 %v4357_v34  ;;  %3663 = vmatprep.subr.bf16.mxu1 %v4359_v36  ;;  %v4405_v34 = vcombine.high %v544_v19, %v548_v21  ;;  %v4407_v36 = vcombine.high %v545_v25, %v549_v27  ;;  %v576_v9 = vld [vmem:[#allocation7 + $0x780] sm:$0xff]  ;;  %v577_v11 = vld [vmem:[#allocation7 + $0x788] sm:$0xff] }
  0xfc   :  { %v580_v10 = vld [vmem:[#allocation7 + $0x7a0] sm:$0xff]  ;;  %v581_v12 = vld [vmem:[#allocation7 + $0x7a8] sm:$0xff] }
  0xfd   :  { %v584_v17 = vld [vmem:[#allocation7 + $0x7c0] sm:$0xff]  ;;  %v585_v61 = vld [vmem:[#allocation7 + $0x7c8] sm:$0xff] }
  0xfe   :  { %3500 = vmatpush1.bf16.msra.mxu0 %v4356_v42  ;;  %3664 = vmatpush1.bf16.msra.mxu1 %v4358_v43  ;;  %v4404_v42 = vcombine.low %v544_v19, %v548_v21  ;;  %v4406_v43 = vcombine.low %v545_v25, %v549_v27  ;;  %v588_v18 = vld [vmem:[#allocation7 + $0x7e0] sm:$0xff]  ;;  %v589_v62 = vld [vmem:[#allocation7 + $0x7e8] sm:$0xff] }
  0xff   :  { %3501 = vmatprep.subr.bf16.mxu0 %v4365_v35  ;;  %3665 = vmatprep.subr.bf16.mxu1 %v4367_v44  ;;  %v4413_v35 = vcombine.high %v552_v38, %v556_v39  ;;  %v4415_v44 = vcombine.high %v553_v40, %v557_v41  ;;  %v592_v19 = vld [vmem:[#allocation7 + $0x800] sm:$0xff]  ;;  %v593_v25 = vld [vmem:[#allocation7 + $0x808] sm:$0xff] }
 0x100   :  { %v596_v21 = vld [vmem:[#allocation7 + $0x820] sm:$0xff]  ;;  %v597_v27 = vld [vmem:[#allocation7 + $0x828] sm:$0xff] }
 0x102   :  { %3502 = vmatpush1.bf16.msra.mxu0 %v4364_v52  ;;  %3666 = vmatpush1.bf16.msra.mxu1 %v4366_v53  ;;  %v4412_v52 = vcombine.low %v552_v38, %v556_v39  ;;  %v4414_v53 = vcombine.low %v553_v40, %v557_v41  ;;  %v4455_v38 = vcombine.high %v593_v25, %v597_v27  ;;  %v325_v39 = vmax.f32 %v5098_v48, 0.0  ;;  %v600_v40 = vld [vmem:[#allocation7 + $0x840] sm:$0xff]  ;;  %v609_v48 = vld [vmem:[#allocation7 + $0x888] sm:$0xff] }
 0x103   :  { %3503 = vmatprep.subr.bf16.mxu0 %v4373_v55  ;;  %3667 = vmatprep.subr.bf16.mxu1 %v4375_v56  ;;  %v4421_v55 = vcombine.high %v560_v45, %v564_v46  ;;  %v4423_v56 = vcombine.high %v561_v49, %v565_v50  ;;  %v604_v41 = vld [vmem:[#allocation7 + $0x860] sm:$0xff] }
 0x106   :  { %3504 = vmatpush1.bf16.msra.mxu0 %v4372_v54  ;;  %3668 = vmatpush1.bf16.msra.mxu1 %v4374_v63  ;;  %v4420_v54 = vcombine.low %v560_v45, %v564_v46  ;;  %v4422_v63 = vcombine.low %v561_v49, %v565_v50  ;;  %v4454_v45 = vcombine.low %v593_v25, %v597_v27  ;;  %v608_v50 = vld [vmem:[#allocation7 + $0x880] sm:$0xff] }
 0x107   :  { %3505 = vmatprep.subr.bf16.mxu0 %v4381_v6  ;;  %3669 = vmatprep.subr.bf16.mxu1 %v4383_v7  ;;  %v4429_v6 = vcombine.high %v568_v57, %v572_v51  ;;  %v4431_v7 = vcombine.high %v569_v58, %v573_v59  ;;  %v5132_v46 = vpack.c.bf16 %v325_v39, %v325_v39  ;;  %v640_v25 = vld [vmem:[#allocation7 + $0x980] sm:$0xff] }
 0x108   :  { %v4461_v49 = vcombine.high %v600_v40, %v604_v41  ;;  %v644_v27 = vld [vmem:[#allocation7 + $0x9a0] sm:$0xff] }
 0x10a   :  { %3506 = vmatpush1.bf16.msra.mxu0 %v4380_v13  ;;  %3670 = vmatpush1.bf16.msra.mxu1 %v4382_v14  ;;  %v4428_v13 = vcombine.low %v568_v57, %v572_v51  ;;  %v4430_v14 = vcombine.low %v569_v58, %v573_v59  ;;  %v616_v58 = vld [vmem:[#allocation7 + $0x8c0] sm:$0xff] }
 0x10b   :  { %3507 = vmatprep.subr.bf16.mxu0 %v4389_v8  ;;  %3671 = vmatprep.subr.bf16.mxu1 %v4391_v16  ;;  %v4437_v8 = vcombine.high %v576_v9, %v580_v10  ;;  %v4439_v16 = vcombine.high %v577_v11, %v581_v12  ;;  %v620_v59 = vld [vmem:[#allocation7 + $0x8e0] sm:$0xff] }
 0x10e   :  { %3508 = vmatpush1.bf16.msra.mxu0 %v4388_v0  ;;  %3672 = vmatpush1.bf16.msra.mxu1 %v4390_v1  ;;  %v4436_v0 = vcombine.low %v576_v9, %v580_v10  ;;  %v4438_v1 = vcombine.low %v577_v11, %v581_v12  ;;  %v4477_v9 = vcombine.high %v616_v58, %v620_v59  ;;  %v624_v11 = vld [vmem:[#allocation7 + $0x900] sm:$0xff] }
 0x10f   :  { %3509 = vmatprep.subr.bf16.mxu0 %v4397_v2  ;;  %3673 = vmatprep.subr.bf16.mxu1 %v4399_v4  ;;  %v4445_v2 = vcombine.high %v584_v17, %v588_v18  ;;  %v4447_v4 = vcombine.high %v585_v61, %v589_v62  ;;  %v628_v12 = vld [vmem:[#allocation7 + $0x920] sm:$0xff] }
 0x112   :  { %3510 = vmatpush1.bf16.msra.mxu0 %v4396_v30  ;;  %3674 = vmatpush1.bf16.msra.mxu1 %v4398_v33  ;;  %v4444_v30 = vcombine.low %v584_v17, %v588_v18  ;;  %v4446_v33 = vcombine.low %v585_v61, %v589_v62  ;;  %v4485_v17 = vcombine.high %v624_v11, %v628_v12  ;;  %v632_v61 = vld [vmem:[#allocation7 + $0x940] sm:$0xff] }
 0x113   :  { %3511 = vmatprep.subr.bf16.mxu0 %v4405_v34  ;;  %3675 = vmatprep.subr.bf16.mxu1 %v4407_v36  ;;  %v322_v34 = vmax.f32 %v5096_v47, 0.0  ;;  %v4453_v36 = vcombine.high %v592_v19, %v596_v21  ;;  %v636_v62 = vld [vmem:[#allocation7 + $0x960] sm:$0xff] }
 0x116   :  { %3512 = vmatpush1.bf16.msra.mxu0 %v4404_v42  ;;  %3676 = vmatpush1.bf16.msra.mxu1 %v4406_v43  ;;  %v601_v42 = vld [vmem:[#allocation7 + $0x848] sm:$0xff] }
 0x117   :  { %3513 = vmatprep.subr.bf16.mxu0 %v4413_v35  ;;  %3677 = vmatprep.subr.bf16.mxu1 %v4415_v44  ;;  %v605_v43 = vld [vmem:[#allocation7 + $0x868] sm:$0xff]  ;;  %v4452_v35 = vcombine.low %v592_v19, %v596_v21  ;;  %v5130_v44 = vpack.c.bf16 %v322_v34, %v322_v34  ;;  %v4493_v19 = vcombine.high %v632_v61, %v636_v62 }
 0x118   :  { %v4463_v47 = vcombine.high %v601_v42, %v605_v43  ;;  %v4492_v34 = vcombine.low %v632_v61, %v636_v62  ;;  %v680_v61 = vld [vmem:[#allocation7 + $0xac0] sm:$0xff] }
 0x119   :  { %v684_v62 = vld [vmem:[#allocation7 + $0xae0] sm:$0xff] }
 0x11a   :  { %3514 = vmatpush1.bf16.msra.mxu0 %v4412_v52  ;;  %3678 = vmatpush1.bf16.msra.mxu1 %v4414_v53  ;;  %v612_v52 = vld [vmem:[#allocation7 + $0x8a0] sm:$0xff]  ;;  %v613_v53 = vld [vmem:[#allocation7 + $0x8a8] sm:$0xff] }
 0x11b   :  { %3515 = vmatprep.subr.bf16.mxu0 %v4421_v55  ;;  %3679 = vmatprep.subr.bf16.mxu1 %v4423_v56  ;;  %v4460_v55 = vcombine.low %v600_v40, %v604_v41  ;;  %v4462_v56 = vcombine.low %v601_v42, %v605_v43  ;;  %v4469_v57 = vcombine.high %v608_v50, %v612_v52  ;;  %v648_v40 = vld [vmem:[#allocation7 + $0x9c0] sm:$0xff]  ;;  %v649_v42 = vld [vmem:[#allocation7 + $0x9c8] sm:$0xff] }
 0x11c   :  { %v4471_v51 = vcombine.high %v609_v48, %v613_v53  ;;  %v652_v41 = vld [vmem:[#allocation7 + $0x9e0] sm:$0xff]  ;;  %v653_v43 = vld [vmem:[#allocation7 + $0x9e8] sm:$0xff] }
 0x11e   :  { %3516 = vmatpush1.bf16.msra.mxu0 %v4420_v54  ;;  %3680 = vmatpush1.bf16.msra.mxu1 %v4422_v63  ;;  %v617_v54 = vld [vmem:[#allocation7 + $0x8c8] sm:$0xff] }
 0x11f   :  { %3517 = vmatprep.subr.bf16.mxu0 %v4429_v6  ;;  %3681 = vmatprep.subr.bf16.mxu1 %v4431_v7  ;;  %v621_v63 = vld [vmem:[#allocation7 + $0x8e8] sm:$0xff]  ;;  %v4468_v6 = vcombine.low %v608_v50, %v612_v52  ;;  %v4470_v7 = vcombine.low %v609_v48, %v613_v53  ;;  %v656_v50 = vld [vmem:[#allocation7 + $0xa00] sm:$0xff] }
 0x120   :  { %v4479_v10 = vcombine.high %v617_v54, %v621_v63  ;;  %v660_v52 = vld [vmem:[#allocation7 + $0xa20] sm:$0xff]  ;;  %v657_v48 = vld [vmem:[#allocation7 + $0xa08] sm:$0xff] }
 0x121   :  { %v661_v53 = vld [vmem:[#allocation7 + $0xa28] sm:$0xff] }
 0x122   :  { %3518 = vmatpush1.bf16.msra.mxu0 %v4428_v13  ;;  %3682 = vmatpush1.bf16.msra.mxu1 %v4430_v14  ;;  %v625_v13 = vld [vmem:[#allocation7 + $0x908] sm:$0xff] }
 0x123   :  { %3519 = vmatprep.subr.bf16.mxu0 %v4437_v8  ;;  %3683 = vmatprep.subr.bf16.mxu1 %v4439_v16  ;;  %v629_v14 = vld [vmem:[#allocation7 + $0x928] sm:$0xff]  ;;  %v4476_v8 = vcombine.low %v616_v58, %v620_v59  ;;  %v4478_v16 = vcombine.low %v617_v54, %v621_v63  ;;  %v664_v58 = vld [vmem:[#allocation7 + $0xa40] sm:$0xff] }
 0x124   :  { %v4487_v18 = vcombine.high %v625_v13, %v629_v14  ;;  %v668_v59 = vld [vmem:[#allocation7 + $0xa60] sm:$0xff]  ;;  %v665_v54 = vld [vmem:[#allocation7 + $0xa48] sm:$0xff] }
 0x125   :  { %v669_v63 = vld [vmem:[#allocation7 + $0xa68] sm:$0xff] }
 0x126   :  { %3520 = vmatpush1.bf16.msra.mxu0 %v4436_v0  ;;  %3684 = vmatpush1.bf16.msra.mxu1 %v4438_v1  ;;  %v633_v0 = vld [vmem:[#allocation7 + $0x948] sm:$0xff] }
 0x127   :  { %3521 = vmatprep.subr.bf16.mxu0 %v4445_v2  ;;  %3685 = vmatprep.subr.bf16.mxu1 %v4447_v4  ;;  %v637_v1 = vld [vmem:[#allocation7 + $0x968] sm:$0xff]  ;;  %v4484_v2 = vcombine.low %v624_v11, %v628_v12  ;;  %v4486_v4 = vcombine.low %v625_v13, %v629_v14  ;;  %v672_v11 = vld [vmem:[#allocation7 + $0xa80] sm:$0xff] }
 0x128   :  { %v4495_v21 = vcombine.high %v633_v0, %v637_v1  ;;  %v676_v12 = vld [vmem:[#allocation7 + $0xaa0] sm:$0xff]  ;;  %v673_v13 = vld [vmem:[#allocation7 + $0xa88] sm:$0xff] }
 0x129   :  { %v677_v14 = vld [vmem:[#allocation7 + $0xaa8] sm:$0xff] }
 0x12a   :  { %3522 = vmatpush1.bf16.msra.mxu0 %v4444_v30  ;;  %3686 = vmatpush1.bf16.msra.mxu1 %v4446_v33  ;;  %v641_v30 = vld [vmem:[#allocation7 + $0x988] sm:$0xff] }
 0x12b   :  { %3532 = vmatprep.subr.bf16.mxu0 %v4453_v36  ;;  %3696 = vmatprep.subr.bf16.mxu1 %v4455_v38  ;;  %v645_v33 = vld [vmem:[#allocation7 + $0x9a8] sm:$0xff]  ;;  %v4494_v36 = vcombine.low %v633_v0, %v637_v1  ;;  %v4501_v38 = vcombine.high %v640_v25, %v644_v27 }
 0x12c   :  { %v4503_v39 = vcombine.high %v641_v30, %v645_v33  ;;  %v681_v0 = vld [vmem:[#allocation7 + $0xac8] sm:$0xff] }
 0x12d   :  { %3524 = vmatmul.mubr.bf16.vlgmr.msra.gmra.mrb[0].mxu0 %v5130_v44  ;;  %3688 = vmatmul.mubr.bf16.vlgmr.msra.gmra.mrb[0].mxu1 %v5130_v44  ;;  %v685_v1 = vld [vmem:[#allocation7 + $0xae8] sm:$0xff] }
 0x12e   :  { %3533 = vmatpush1.bf16.msra.mxu0 %v4452_v35  ;;  %3564 = vmatprep.mubr.bf16.mxu0 %v5132_v46  ;;  %v4500_v35 = vcombine.low %v640_v25, %v644_v27  ;;  %v688_v25 = vld [vmem:[#allocation7 + $0xb00] sm:$0xff] }
 0x12f   :  { %3697 = vmatpush1.bf16.msra.mxu1 %v4454_v45  ;;  %3728 = vmatprep.mubr.bf16.mxu1 %v5132_v46  ;;  %v4502_v45 = vcombine.low %v641_v30, %v645_v33  ;;  %v692_v27 = vld [vmem:[#allocation7 + $0xb20] sm:$0xff]  ;;  %v689_v30 = vld [vmem:[#allocation7 + $0xb08] sm:$0xff] }
 0x130   :  { %3534 = vmatprep.subr.bf16.mxu0 %v4461_v49  ;;  %3698 = vmatprep.subr.bf16.mxu1 %v4463_v47  ;;  %v4509_v49 = vcombine.high %v648_v40, %v652_v41  ;;  %v4511_v47 = vcombine.high %v649_v42, %v653_v43  ;;  %v693_v33 = vld [vmem:[#allocation7 + $0xb28] sm:$0xff] }
 0x132   :  { %3535 = vmatpush1.bf16.msra.mxu0 %v4460_v55  ;;  %v4508_v55 = vcombine.low %v648_v40, %v652_v41  ;;  %v696_v40 = vld [vmem:[#allocation7 + $0xb40] sm:$0xff] }
 0x133   :  { %3699 = vmatpush1.bf16.msra.mxu1 %v4462_v56  ;;  %3536 = vmatprep.subr.bf16.mxu0 %v4469_v57  ;;  %v4510_v56 = vcombine.low %v649_v42, %v653_v43  ;;  %v4517_v57 = vcombine.high %v656_v50, %v660_v52  ;;  %v700_v41 = vld [vmem:[#allocation7 + $0xb60] sm:$0xff]  ;;  %v697_v42 = vld [vmem:[#allocation7 + $0xb48] sm:$0xff] }
 0x134   :  { %3700 = vmatprep.subr.bf16.mxu1 %v4471_v51  ;;  %v4519_v51 = vcombine.high %v657_v48, %v661_v53  ;;  %v701_v43 = vld [vmem:[#allocation7 + $0xb68] sm:$0xff] }
 0x136   :  { %3537 = vmatpush1.bf16.msra.mxu0 %v4468_v6  ;;  %v4516_v6 = vcombine.low %v656_v50, %v660_v52  ;;  %v704_v50 = vld [vmem:[#allocation7 + $0xb80] sm:$0xff] }
 0x137   :  { %3701 = vmatpush1.bf16.msra.mxu1 %v4470_v7  ;;  %3538 = vmatprep.subr.bf16.mxu0 %v4477_v9  ;;  %v4518_v7 = vcombine.low %v657_v48, %v661_v53  ;;  %v4525_v9 = vcombine.high %v664_v58, %v668_v59  ;;  %v708_v52 = vld [vmem:[#allocation7 + $0xba0] sm:$0xff]  ;;  %v705_v48 = vld [vmem:[#allocation7 + $0xb88] sm:$0xff] }
 0x138   :  { %3702 = vmatprep.subr.bf16.mxu1 %v4479_v10  ;;  %v4527_v10 = vcombine.high %v665_v54, %v669_v63  ;;  %v709_v53 = vld [vmem:[#allocation7 + $0xba8] sm:$0xff] }
 0x13a   :  { %3539 = vmatpush1.bf16.msra.mxu0 %v4476_v8  ;;  %v4524_v8 = vcombine.low %v664_v58, %v668_v59  ;;  %v712_v58 = vld [vmem:[#allocation7 + $0xbc0] sm:$0xff] }
 0x13b   :  { %3703 = vmatpush1.bf16.msra.mxu1 %v4478_v16  ;;  %3540 = vmatprep.subr.bf16.mxu0 %v4485_v17  ;;  %v4526_v16 = vcombine.low %v665_v54, %v669_v63  ;;  %v4533_v17 = vcombine.high %v672_v11, %v676_v12  ;;  %v716_v59 = vld [vmem:[#allocation7 + $0xbe0] sm:$0xff]  ;;  %v713_v54 = vld [vmem:[#allocation7 + $0xbc8] sm:$0xff] }
 0x13c   :  { %3704 = vmatprep.subr.bf16.mxu1 %v4487_v18  ;;  %v4535_v18 = vcombine.high %v673_v13, %v677_v14  ;;  %v717_v63 = vld [vmem:[#allocation7 + $0xbe8] sm:$0xff] }
 0x13e   :  { %3541 = vmatpush1.bf16.msra.mxu0 %v4484_v2  ;;  %v4532_v2 = vcombine.low %v672_v11, %v676_v12  ;;  %v720_v11 = vld [vmem:[#allocation7 + $0xc00] sm:$0xff] }
 0x13f   :  { %3705 = vmatpush1.bf16.msra.mxu1 %v4486_v4  ;;  %3542 = vmatprep.subr.bf16.mxu0 %v4493_v19  ;;  %v4534_v4 = vcombine.low %v673_v13, %v677_v14  ;;  %v4541_v19 = vcombine.high %v680_v61, %v684_v62  ;;  %v724_v12 = vld [vmem:[#allocation7 + $0xc20] sm:$0xff]  ;;  %v721_v13 = vld [vmem:[#allocation7 + $0xc08] sm:$0xff] }
 0x140   :  { %3706 = vmatprep.subr.bf16.mxu1 %v4495_v21  ;;  %v4543_v21 = vcombine.high %v681_v0, %v685_v1  ;;  %v725_v14 = vld [vmem:[#allocation7 + $0xc28] sm:$0xff] }
 0x142   :  { %3543 = vmatpush1.bf16.msra.mxu0 %v4492_v34  ;;  %v4540_v34 = vcombine.low %v680_v61, %v684_v62  ;;  %v4583_v61 = vcombine.high %v721_v13, %v725_v14  ;;  %v327_v62 = vmax.f32 %v5110_v5, 0.0 }
 0x143   :  { %3707 = vmatpush1.bf16.msra.mxu1 %v4494_v36  ;;  %3544 = vmatprep.subr.bf16.mxu0 %v4501_v38  ;;  %v4542_v36 = vcombine.low %v681_v0, %v685_v1  ;;  %v4549_v38 = vcombine.high %v688_v25, %v692_v27  ;;  %v728_v0 = vld [vmem:[#allocation7 + $0xc40] sm:$0xff] }
 0x144   :  { %3708 = vmatprep.subr.bf16.mxu1 %v4503_v39  ;;  %v4551_v39 = vcombine.high %v689_v30, %v693_v33  ;;  %v732_v1 = vld [vmem:[#allocation7 + $0xc60] sm:$0xff] }
 0x146   :  { %3545 = vmatpush1.bf16.msra.mxu0 %v4500_v35  ;;  %v4548_v35 = vcombine.low %v688_v25, %v692_v27  ;;  %v4582_v25 = vcombine.low %v721_v13, %v725_v14  ;;  %v4589_v27 = vcombine.high %v728_v0, %v732_v1  ;;  %v768_v13 = vld [vmem:[#allocation7 + $0xd80] sm:$0xff] }
 0x147   :  { %3709 = vmatpush1.bf16.msra.mxu1 %v4502_v45  ;;  %3546 = vmatprep.subr.bf16.mxu0 %v4509_v49  ;;  %v4550_v45 = vcombine.low %v689_v30, %v693_v33  ;;  %v4557_v49 = vcombine.high %v696_v40, %v700_v41  ;;  %v736_v30 = vld [vmem:[#allocation7 + $0xc80] sm:$0xff]  ;;  %v5143_v33 = vpack.c.bf16 %v327_v62, %v327_v62 }
 0x148   :  { %3710 = vmatprep.subr.bf16.mxu1 %v4511_v47  ;;  %v4559_v47 = vcombine.high %v697_v42, %v701_v43  ;;  %v772_v14 = vld [vmem:[#allocation7 + $0xda0] sm:$0xff] }
 0x14a   :  { %3547 = vmatpush1.bf16.msra.mxu0 %v4508_v55  ;;  %v4556_v55 = vcombine.low %v696_v40, %v700_v41 }
 0x14b   :  { %3711 = vmatpush1.bf16.msra.mxu1 %v4510_v56  ;;  %3548 = vmatprep.subr.bf16.mxu0 %v4517_v57  ;;  %v4558_v56 = vcombine.low %v697_v42, %v701_v43  ;;  %v4565_v57 = vcombine.high %v704_v50, %v708_v52  ;;  %v744_v42 = vld [vmem:[#allocation7 + $0xcc0] sm:$0xff] }
 0x14c   :  { %3712 = vmatprep.subr.bf16.mxu1 %v4519_v51  ;;  %v4567_v51 = vcombine.high %v705_v48, %v709_v53  ;;  %v748_v43 = vld [vmem:[#allocation7 + $0xce0] sm:$0xff] }
 0x14e   :  { %3549 = vmatpush1.bf16.msra.mxu0 %v4516_v6  ;;  %v4564_v6 = vcombine.low %v704_v50, %v708_v52  ;;  %v4605_v50 = vcombine.high %v744_v42, %v748_v43 }
 0x14f   :  { %3713 = vmatpush1.bf16.msra.mxu1 %v4518_v7  ;;  %3550 = vmatprep.subr.bf16.mxu0 %v4525_v9  ;;  %v4566_v7 = vcombine.low %v705_v48, %v709_v53  ;;  %v4573_v9 = vcombine.high %v712_v58, %v716_v59  ;;  %v752_v48 = vld [vmem:[#allocation7 + $0xd00] sm:$0xff] }
 0x150   :  { %3714 = vmatprep.subr.bf16.mxu1 %v4527_v10  ;;  %v4575_v10 = vcombine.high %v713_v54, %v717_v63  ;;  %v756_v53 = vld [vmem:[#allocation7 + $0xd20] sm:$0xff] }
 0x152   :  { %3551 = vmatpush1.bf16.msra.mxu0 %v4524_v8  ;;  %v4572_v8 = vcombine.low %v712_v58, %v716_v59  ;;  %v4613_v58 = vcombine.high %v752_v48, %v756_v53 }
 0x153   :  { %3715 = vmatpush1.bf16.msra.mxu1 %v4526_v16  ;;  %3552 = vmatprep.subr.bf16.mxu0 %v4533_v17  ;;  %v4574_v16 = vcombine.low %v713_v54, %v717_v63  ;;  %v324_v17 = vmax.f32 %v5108_v3, 0.0  ;;  %v740_v3 = vld [vmem:[#allocation7 + $0xca0] sm:$0xff] }
 0x154   :  { %3716 = vmatprep.subr.bf16.mxu1 %v4535_v18  ;;  %v4581_v18 = vcombine.high %v720_v11, %v724_v12  ;;  %v4597_v40 = vcombine.high %v736_v30, %v740_v3  ;;  %v760_v54 = vld [vmem:[#allocation7 + $0xd40] sm:$0xff] }
 0x155   :  { %v764_v63 = vld [vmem:[#allocation7 + $0xd60] sm:$0xff] }
 0x156   :  { %3553 = vmatpush1.bf16.msra.mxu0 %v4532_v2  ;;  %v4580_v2 = vcombine.low %v720_v11, %v724_v12  ;;  %v4621_v11 = vcombine.high %v760_v54, %v764_v63 }
 0x157   :  { %3717 = vmatpush1.bf16.msra.mxu1 %v4534_v4  ;;  %3554 = vmatprep.subr.bf16.mxu0 %v4541_v19  ;;  %v729_v4 = vld [vmem:[#allocation7 + $0xc48] sm:$0xff] }
 0x158   :  { %3718 = vmatprep.subr.bf16.mxu1 %v4543_v21  ;;  %v733_v19 = vld [vmem:[#allocation7 + $0xc68] sm:$0xff]  ;;  %v5140_v21 = vpack.c.bf16 %v324_v17, %v324_v17  ;;  %v4620_v17 = vcombine.low %v760_v54, %v764_v63  ;;  %v808_v54 = vld [vmem:[#allocation7 + $0xec0] sm:$0xff] }
 0x159   :  { %v4591_v5 = vcombine.high %v729_v4, %v733_v19  ;;  %v812_v63 = vld [vmem:[#allocation7 + $0xee0] sm:$0xff] }
 0x15a   :  { %3555 = vmatpush1.bf16.msra.mxu0 %v4540_v34  ;;  %v737_v34 = vld [vmem:[#allocation7 + $0xc88] sm:$0xff] }
 0x15b   :  { %3719 = vmatpush1.bf16.msra.mxu1 %v4542_v36  ;;  %3556 = vmatprep.subr.bf16.mxu0 %v4549_v38  ;;  %v741_v36 = vld [vmem:[#allocation7 + $0xca8] sm:$0xff]  ;;  %v4588_v38 = vcombine.low %v728_v0, %v732_v1  ;;  %v776_v0 = vld [vmem:[#allocation7 + $0xdc0] sm:$0xff] }
 0x15c   :  { %3720 = vmatprep.subr.bf16.mxu1 %v4551_v39  ;;  %v4590_v39 = vcombine.low %v729_v4, %v733_v19  ;;  %v4599_v41 = vcombine.high %v737_v34, %v741_v36  ;;  %v780_v1 = vld [vmem:[#allocation7 + $0xde0] sm:$0xff]  ;;  %v781_v4 = vld [vmem:[#allocation7 + $0xde8] sm:$0xff]  ;;  %v4628_v19 = vcombine.low %v768_v13, %v772_v14 }
 0x15e   :  { %3557 = vmatpush1.bf16.msra.mxu0 %v4548_v35  ;;  %v745_v35 = vld [vmem:[#allocation7 + $0xcc8] sm:$0xff] }
 0x15f   :  { %3721 = vmatpush1.bf16.msra.mxu1 %v4550_v45  ;;  %3558 = vmatprep.subr.bf16.mxu0 %v4557_v49  ;;  %v749_v45 = vld [vmem:[#allocation7 + $0xce8] sm:$0xff]  ;;  %v4596_v49 = vcombine.low %v736_v30, %v740_v3  ;;  %v784_v3 = vld [vmem:[#allocation7 + $0xe00] sm:$0xff] }
 0x160   :  { %3722 = vmatprep.subr.bf16.mxu1 %v4559_v47  ;;  %v4598_v47 = vcombine.low %v737_v34, %v741_v36  ;;  %v4607_v52 = vcombine.high %v745_v35, %v749_v45  ;;  %v785_v34 = vld [vmem:[#allocation7 + $0xe08] sm:$0xff] }
 0x161   :  { %v789_v36 = vld [vmem:[#allocation7 + $0xe28] sm:$0xff] }
 0x162   :  { %3559 = vmatpush1.bf16.msra.mxu0 %v4556_v55  ;;  %v753_v55 = vld [vmem:[#allocation7 + $0xd08] sm:$0xff] }
 0x163   :  { %3723 = vmatpush1.bf16.msra.mxu1 %v4558_v56  ;;  %3560 = vmatprep.subr.bf16.mxu0 %v4565_v57  ;;  %v757_v56 = vld [vmem:[#allocation7 + $0xd28] sm:$0xff]  ;;  %v4604_v57 = vcombine.low %v744_v42, %v748_v43  ;;  %v792_v42 = vld [vmem:[#allocation7 + $0xe40] sm:$0xff] }
 0x164   :  { %3724 = vmatprep.subr.bf16.mxu1 %v4567_v51  ;;  %v4606_v51 = vcombine.low %v745_v35, %v749_v45  ;;  %v4615_v59 = vcombine.high %v753_v55, %v757_v56  ;;  %v796_v43 = vld [vmem:[#allocation7 + $0xe60] sm:$0xff]  ;;  %v793_v35 = vld [vmem:[#allocation7 + $0xe48] sm:$0xff] }
 0x165   :  { %v797_v45 = vld [vmem:[#allocation7 + $0xe68] sm:$0xff] }
 0x166   :  { %3561 = vmatpush1.bf16.msra.mxu0 %v4564_v6  ;;  %v761_v6 = vld [vmem:[#allocation7 + $0xd48] sm:$0xff] }
 0x167   :  { %3725 = vmatpush1.bf16.msra.mxu1 %v4566_v7  ;;  %3562 = vmatprep.subr.bf16.mxu0 %v4573_v9  ;;  %v765_v7 = vld [vmem:[#allocation7 + $0xd68] sm:$0xff]  ;;  %v4612_v9 = vcombine.low %v752_v48, %v756_v53  ;;  %v800_v48 = vld [vmem:[#allocation7 + $0xe80] sm:$0xff] }
 0x168   :  { %3726 = vmatprep.subr.bf16.mxu1 %v4575_v10  ;;  %v4614_v10 = vcombine.low %v753_v55, %v757_v56  ;;  %v4623_v12 = vcombine.high %v761_v6, %v765_v7  ;;  %v804_v53 = vld [vmem:[#allocation7 + $0xea0] sm:$0xff]  ;;  %v801_v55 = vld [vmem:[#allocation7 + $0xe88] sm:$0xff] }
 0x169   :  { %v805_v56 = vld [vmem:[#allocation7 + $0xea8] sm:$0xff] }
 0x16a   :  { %3563 = vmatpush1.bf16.msra.mxu0 %v4572_v8  ;;  %v769_v8 = vld [vmem:[#allocation7 + $0xd88] sm:$0xff] }
 0x16b   :  { %3727 = vmatpush1.bf16.msra.mxu1 %v4574_v16  ;;  %3573 = vmatprep.subr.bf16.mxu0 %v4581_v18  ;;  %v773_v16 = vld [vmem:[#allocation7 + $0xda8] sm:$0xff]  ;;  %v4622_v18 = vcombine.low %v761_v6, %v765_v7 }
 0x16c   :  { %3737 = vmatprep.subr.bf16.mxu1 %v4583_v61  ;;  %v4629_v61 = vcombine.high %v768_v13, %v772_v14  ;;  %v4631_v62 = vcombine.high %v769_v8, %v773_v16  ;;  %v809_v6 = vld [vmem:[#allocation7 + $0xec8] sm:$0xff]  ;;  %v816_v13 = vld [vmem:[#allocation7 + $0xf00] sm:$0xff] }
 0x16d   :  { %3565 = vmatmul.mubr.bf16.vlgmr.msra.gmra.mrb[0].mxu0 %v5140_v21  ;;  %v813_v7 = vld [vmem:[#allocation7 + $0xee8] sm:$0xff]  ;;  %v820_v14 = vld [vmem:[#allocation7 + $0xf20] sm:$0xff] }
 0x16e   :  { %3729 = vmatmul.mubr.bf16.vlgmr.msra.gmra.mrb[0].mxu1 %v5140_v21  ;;  %3574 = vmatpush1.bf16.msra.mxu0 %v4580_v2  ;;  %v777_v2 = vld [vmem:[#allocation7 + $0xdc8] sm:$0xff] }
 0x16f   :  { %3605 = vmatprep.mubr.bf16.mxu0 %v5143_v33  ;;  %3738 = vmatpush1.bf16.msra.mxu1 %v4582_v25  ;;  %v4630_v25 = vcombine.low %v769_v8, %v773_v16  ;;  %v4639_v30 = vcombine.high %v777_v2, %v781_v4  ;;  %v817_v8 = vld [vmem:[#allocation7 + $0xf08] sm:$0xff] }
 0x170   :  { %3769 = vmatprep.mubr.bf16.mxu1 %v5143_v33  ;;  %3575 = vmatprep.subr.bf16.mxu0 %v4589_v27  ;;  %v4637_v27 = vcombine.high %v776_v0, %v780_v1  ;;  %v821_v16 = vld [vmem:[#allocation7 + $0xf28] sm:$0xff] }
 0x171   :  { %3739 = vmatprep.subr.bf16.mxu1 %v4591_v5  ;;  %v788_v5 = vld [vmem:[#allocation7 + $0xe20] sm:$0xff] }
 0x172   :  { %3576 = vmatpush1.bf16.msra.mxu0 %v4588_v38  ;;  %v4636_v38 = vcombine.low %v776_v0, %v780_v1  ;;  %v824_v0 = vld [vmem:[#allocation7 + $0xf40] sm:$0xff] }
 0x173   :  { %3740 = vmatpush1.bf16.msra.mxu1 %v4590_v39  ;;  %3577 = vmatprep.subr.bf16.mxu0 %v4597_v40  ;;  %v4638_v39 = vcombine.low %v777_v2, %v781_v4  ;;  %v4645_v40 = vcombine.high %v784_v3, %v788_v5  ;;  %v828_v1 = vld [vmem:[#allocation7 + $0xf60] sm:$0xff]  ;;  %v825_v2 = vld [vmem:[#allocation7 + $0xf48] sm:$0xff] }
 0x174   :  { %3741 = vmatprep.subr.bf16.mxu1 %v4599_v41  ;;  %v4647_v41 = vcombine.high %v785_v34, %v789_v36  ;;  %v829_v4 = vld [vmem:[#allocation7 + $0xf68] sm:$0xff] }
 0x176   :  { %3578 = vmatpush1.bf16.msra.mxu0 %v4596_v49  ;;  %v4644_v49 = vcombine.low %v784_v3, %v788_v5  ;;  %v832_v3 = vld [vmem:[#allocation7 + $0xf80] sm:$0xff] }
 0x177   :  { %3742 = vmatpush1.bf16.msra.mxu1 %v4598_v47  ;;  %3579 = vmatprep.subr.bf16.mxu0 %v4605_v50  ;;  %v4646_v47 = vcombine.low %v785_v34, %v789_v36  ;;  %v4653_v50 = vcombine.high %v792_v42, %v796_v43  ;;  %v836_v5 = vld [vmem:[#allocation7 + $0xfa0] sm:$0xff]  ;;  %v833_v34 = vld [vmem:[#allocation7 + $0xf88] sm:$0xff] }
 0x178   :  { %3743 = vmatprep.subr.bf16.mxu1 %v4607_v52  ;;  %v4655_v52 = vcombine.high %v793_v35, %v797_v45  ;;  %v837_v36 = vld [vmem:[#allocation7 + $0xfa8] sm:$0xff] }
 0x17a   :  { %3580 = vmatpush1.bf16.msra.mxu0 %v4604_v57  ;;  %v4652_v57 = vcombine.low %v792_v42, %v796_v43  ;;  %v840_v42 = vld [vmem:[#allocation7 + $0xfc0] sm:$0xff] }
 0x17b   :  { %3744 = vmatpush1.bf16.msra.mxu1 %v4606_v51  ;;  %3581 = vmatprep.subr.bf16.mxu0 %v4613_v58  ;;  %v4654_v51 = vcombine.low %v793_v35, %v797_v45  ;;  %v4661_v58 = vcombine.high %v800_v48, %v804_v53  ;;  %v844_v43 = vld [vmem:[#allocation7 + $0xfe0] sm:$0xff]  ;;  %v841_v35 = vld [vmem:[#allocation7 + $0xfc8] sm:$0xff] }
 0x17c   :  { %3745 = vmatprep.subr.bf16.mxu1 %v4615_v59  ;;  %v4663_v59 = vcombine.high %v801_v55, %v805_v56  ;;  %v845_v45 = vld [vmem:[#allocation7 + $0xfe8] sm:$0xff] }
 0x17e   :  { %3582 = vmatpush1.bf16.msra.mxu0 %v4612_v9  ;;  %v4660_v9 = vcombine.low %v800_v48, %v804_v53  ;;  %v338_v48 = vld [vmem:[#allocation7 + $0x10] sm:$0xff] }
 0x17f   :  { %3746 = vmatpush1.bf16.msra.mxu1 %v4614_v10  ;;  %3583 = vmatprep.subr.bf16.mxu0 %v4621_v11  ;;  %v4662_v10 = vcombine.low %v801_v55, %v805_v56  ;;  %v4669_v11 = vcombine.high %v808_v54, %v812_v63  ;;  %v342_v53 = vld [vmem:[#allocation7 + $0x30] sm:$0xff]  ;;  %v339_v55 = vld [vmem:[#allocation7 + $0x18] sm:$0xff] }
 0x180   :  { %3747 = vmatprep.subr.bf16.mxu1 %v4623_v12  ;;  %v4671_v12 = vcombine.high %v809_v6, %v813_v7  ;;  %v343_v56 = vld [vmem:[#allocation7 + $0x38] sm:$0xff] }
 0x182   :  { %3584 = vmatpush1.bf16.msra.mxu0 %v4620_v17  ;;  %v4668_v17 = vcombine.low %v808_v54, %v812_v63  ;;  %v4203_v54 = vcombine.high %v339_v55, %v343_v56  ;;  %v346_v63 = vld [vmem:[#allocation7 + $0x50] sm:$0xff] }
 0x183   :  { %3748 = vmatpush1.bf16.msra.mxu1 %v4622_v18  ;;  %3585 = vmatprep.subr.bf16.mxu0 %v4629_v61  ;;  %v4670_v18 = vcombine.low %v809_v6, %v813_v7  ;;  %v4677_v61 = vcombine.high %v816_v13, %v820_v14  ;;  %v350_v6 = vld [vmem:[#allocation7 + $0x70] sm:$0xff]  ;;  %v4200_v7 = vcombine.low %v338_v48, %v342_v53 }
 0x184   :  { %3749 = vmatprep.subr.bf16.mxu1 %v4631_v62  ;;  %v4679_v62 = vcombine.high %v817_v8, %v821_v16 }
 0x186   :  { %3586 = vmatpush1.bf16.msra.mxu0 %v4628_v19  ;;  %v4676_v19 = vcombine.low %v816_v13, %v820_v14  ;;  %v4209_v13 = vcombine.high %v346_v63, %v350_v6  ;;  %v354_v14 = vld [vmem:[#allocation7 + $0x90] sm:$0xff] }
 0x187   :  { %3750 = vmatpush1.bf16.msra.mxu1 %v4630_v25  ;;  %3587 = vmatprep.subr.bf16.mxu0 %v4637_v27  ;;  %v4678_v25 = vcombine.low %v817_v8, %v821_v16  ;;  %v4685_v27 = vcombine.high %v824_v0, %v828_v1  ;;  %v358_v8 = vld [vmem:[#allocation7 + $0xb0] sm:$0xff]  ;;  %v355_v16 = vld [vmem:[#allocation7 + $0x98] sm:$0xff] }
 0x188   :  { %3751 = vmatprep.subr.bf16.mxu1 %v4639_v30  ;;  %v4687_v30 = vcombine.high %v825_v2, %v829_v4 }
 0x18a   :  { %3588 = vmatpush1.bf16.msra.mxu0 %v4636_v38  ;;  %v4684_v38 = vcombine.low %v824_v0, %v828_v1  ;;  %v362_v1 = vld [vmem:[#allocation7 + $0xd0] sm:$0xff] }
 0x18b   :  { %3752 = vmatpush1.bf16.msra.mxu1 %v4638_v39  ;;  %3589 = vmatprep.subr.bf16.mxu0 %v4645_v40  ;;  %v4686_v39 = vcombine.low %v825_v2, %v829_v4  ;;  %v4693_v40 = vcombine.high %v832_v3, %v836_v5  ;;  %v366_v2 = vld [vmem:[#allocation7 + $0xf0] sm:$0xff]  ;;  %v363_v4 = vld [vmem:[#allocation7 + $0xd8] sm:$0xff] }
 0x18c   :  { %3753 = vmatprep.subr.bf16.mxu1 %v4647_v41  ;;  %v4695_v41 = vcombine.high %v833_v34, %v837_v36 }
 0x18e   :  { %3590 = vmatpush1.bf16.msra.mxu0 %v4644_v49  ;;  %v4692_v49 = vcombine.low %v832_v3, %v836_v5  ;;  %v370_v5 = vld [vmem:[#allocation7 + $0x110] sm:$0xff] }
 0x18f   :  { %3754 = vmatpush1.bf16.msra.mxu1 %v4646_v47  ;;  %3591 = vmatprep.subr.bf16.mxu0 %v4653_v50  ;;  %v4694_v47 = vcombine.low %v833_v34, %v837_v36  ;;  %v4701_v50 = vcombine.high %v840_v42, %v844_v43  ;;  %v374_v34 = vld [vmem:[#allocation7 + $0x130] sm:$0xff]  ;;  %v371_v36 = vld [vmem:[#allocation7 + $0x118] sm:$0xff] }
 0x190   :  { %3755 = vmatprep.subr.bf16.mxu1 %v4655_v52  ;;  %v4703_v52 = vcombine.high %v841_v35, %v845_v45 }
 0x192   :  { %3592 = vmatpush1.bf16.msra.mxu0 %v4652_v57  ;;  %v4700_v57 = vcombine.low %v840_v42, %v844_v43  ;;  %v378_v42 = vld [vmem:[#allocation7 + $0x150] sm:$0xff] }
 0x193   :  { %3756 = vmatpush1.bf16.msra.mxu1 %v4654_v51  ;;  %3593 = vmatprep.subr.bf16.mxu0 %v4661_v58  ;;  %v4702_v51 = vcombine.low %v841_v35, %v845_v45  ;;  %v326_v58 = vmax.f32 %v5124_v15, 0.0  ;;  %v382_v43 = vld [vmem:[#allocation7 + $0x170] sm:$0xff]  ;;  %v379_v35 = vld [vmem:[#allocation7 + $0x158] sm:$0xff] }
 0x194   :  { %3757 = vmatprep.subr.bf16.mxu1 %v4663_v59  ;;  %v4201_v59 = vcombine.high %v338_v48, %v342_v53  ;;  %v383_v45 = vld [vmem:[#allocation7 + $0x178] sm:$0xff]  ;;  %v386_v48 = vld [vmem:[#allocation7 + $0x190] sm:$0xff] }
 0x195   :  { %v390_v53 = vld [vmem:[#allocation7 + $0x1b0] sm:$0xff] }
 0x196   :  { %3594 = vmatpush1.bf16.msra.mxu0 %v4660_v9  ;;  %v347_v9 = vld [vmem:[#allocation7 + $0x58] sm:$0xff] }
 0x197   :  { %3758 = vmatpush1.bf16.msra.mxu1 %v4662_v10  ;;  %3595 = vmatprep.subr.bf16.mxu0 %v4669_v11  ;;  %v351_v10 = vld [vmem:[#allocation7 + $0x78] sm:$0xff]  ;;  %v5149_v11 = vpack.c.bf16 %v326_v58, %v326_v58  ;;  %v4249_v58 = vcombine.high %v386_v48, %v390_v53 }
 0x198   :  { %3759 = vmatprep.subr.bf16.mxu1 %v4671_v12  ;;  %v4202_v12 = vcombine.low %v339_v55, %v343_v56  ;;  %v4211_v15 = vcombine.high %v347_v9, %v351_v10  ;;  %v387_v55 = vld [vmem:[#allocation7 + $0x198] sm:$0xff] }
 0x199   :  { %v391_v56 = vld [vmem:[#allocation7 + $0x1b8] sm:$0xff] }
 0x19a   :  { %3596 = vmatpush1.bf16.msra.mxu0 %v4668_v17  ;;  %v359_v17 = vld [vmem:[#allocation7 + $0xb8] sm:$0xff] }
 0x19b   :  { %3760 = vmatpush1.bf16.msra.mxu1 %v4670_v18  ;;  %3597 = vmatprep.subr.bf16.mxu0 %v4677_v61  ;;  %v4208_v18 = vcombine.low %v346_v63, %v350_v6  ;;  %v4210_v61 = vcombine.low %v347_v9, %v351_v10  ;;  %v4219_v0 = vcombine.high %v355_v16, %v359_v17  ;;  %v398_v63 = vld [vmem:[#allocation7 + $0x1f0] sm:$0xff]  ;;  %v395_v6 = vld [vmem:[#allocation7 + $0x1d8] sm:$0xff] }
 0x19c   :  { %3761 = vmatprep.subr.bf16.mxu1 %v4679_v62  ;;  %v4217_v62 = vcombine.high %v354_v14, %v358_v8  ;;  %v4248_v9 = vcombine.low %v386_v48, %v390_v53  ;;  %v4250_v10 = vcombine.low %v387_v55, %v391_v56  ;;  %v438_v48 = vld [vmem:[#allocation7 + $0x330] sm:$0xff]  ;;  %v435_v53 = vld [vmem:[#allocation7 + $0x318] sm:$0xff] }
 0x19e   :  { %3598 = vmatpush1.bf16.msra.mxu0 %v4676_v19  ;;  %v367_v19 = vld [vmem:[#allocation7 + $0xf8] sm:$0xff] }
 0x19f   :  { %3762 = vmatpush1.bf16.msra.mxu1 %v4678_v25  ;;  %3599 = vmatprep.subr.bf16.mxu0 %v4685_v27  ;;  %v4216_v25 = vcombine.low %v354_v14, %v358_v8  ;;  %v4218_v27 = vcombine.low %v355_v16, %v359_v17  ;;  %v4227_v3 = vcombine.high %v363_v4, %v367_v19  ;;  %v402_v14 = vld [vmem:[#allocation7 + $0x210] sm:$0xff]  ;;  %v407_v16 = vld [vmem:[#allocation7 + $0x238] sm:$0xff] }
 0x1a0   :  { %3763 = vmatprep.subr.bf16.mxu1 %v4687_v30  ;;  %v4225_v30 = vcombine.high %v362_v1, %v366_v2  ;;  %v406_v8 = vld [vmem:[#allocation7 + $0x230] sm:$0xff] }
 0x1a2   :  { %3600 = vmatpush1.bf16.msra.mxu0 %v4684_v38  ;;  %v375_v38 = vld [vmem:[#allocation7 + $0x138] sm:$0xff] }
 0x1a3   :  { %3764 = vmatpush1.bf16.msra.mxu1 %v4686_v39  ;;  %3601 = vmatprep.subr.bf16.mxu0 %v4693_v40  ;;  %v4226_v39 = vcombine.low %v363_v4, %v367_v19  ;;  %v4233_v40 = vcombine.high %v370_v5, %v374_v34  ;;  %v415_v4 = vld [vmem:[#allocation7 + $0x278] sm:$0xff]  ;;  %v4264_v19 = vcombine.low %v402_v14, %v406_v8 }
 0x1a4   :  { %3765 = vmatprep.subr.bf16.mxu1 %v4695_v41  ;;  %v4235_v41 = vcombine.high %v371_v36, %v375_v38 }
 0x1a6   :  { %3602 = vmatpush1.bf16.msra.mxu0 %v4692_v49  ;;  %v4232_v49 = vcombine.low %v370_v5, %v374_v34  ;;  %v422_v5 = vld [vmem:[#allocation7 + $0x2b0] sm:$0xff]  ;;  %v419_v34 = vld [vmem:[#allocation7 + $0x298] sm:$0xff] }
 0x1a7   :  { %3766 = vmatpush1.bf16.msra.mxu1 %v4694_v47  ;;  %3603 = vmatprep.subr.bf16.mxu0 %v4701_v50  ;;  %v4234_v47 = vcombine.low %v371_v36, %v375_v38  ;;  %v4241_v50 = vcombine.high %v378_v42, %v382_v43  ;;  %v423_v36 = vld [vmem:[#allocation7 + $0x2b8] sm:$0xff] }
 0x1a8   :  { %3767 = vmatprep.subr.bf16.mxu1 %v4703_v52  ;;  %v4243_v52 = vcombine.high %v379_v35, %v383_v45 }
 0x1aa   :  { %3604 = vmatpush1.bf16.msra.mxu0 %v4700_v57  ;;  %v4240_v57 = vcombine.low %v378_v42, %v382_v43  ;;  %v430_v42 = vld [vmem:[#allocation7 + $0x2f0] sm:$0xff]  ;;  %v427_v43 = vld [vmem:[#allocation7 + $0x2d8] sm:$0xff] }
 0x1ab   :  { %3768 = vmatpush1.bf16.msra.mxu1 %v4702_v51  ;;  %3778 = vmatprep.subr.bf16.mxu0 %v4201_v59  ;;  %v4242_v51 = vcombine.low %v379_v35, %v383_v45  ;;  %v4251_v59 = vcombine.high %v387_v55, %v391_v56  ;;  %v431_v35 = vld [vmem:[#allocation7 + $0x2f8] sm:$0xff] }
 0x1ac   :  { %3942 = vmatprep.subr.bf16.mxu1 %v4203_v54  ;;  %v394_v54 = vld [vmem:[#allocation7 + $0x1d0] sm:$0xff]  ;;  %v439_v55 = vld [vmem:[#allocation7 + $0x338] sm:$0xff] }
 0x1ad   :  { %3606 = vmatmul.mubr.bf16.vlgmr.msra.gmra.mrb[0].mxu0 %v5149_v11  ;;  %v4256_v17 = vcombine.low %v394_v54, %v398_v63 }
 0x1ae   :  { %3770 = vmatmul.mubr.bf16.vlgmr.msra.gmra.mrb[0].mxu1 %v5149_v11  ;;  %3779 = vmatpush1.bf16.msra.mxu0 %v4200_v7  ;;  %v399_v7 = vld [vmem:[#allocation7 + $0x1f8] sm:$0xff] }
 0x1af   :  { %3810 = vmatprep.mubr.bf16.mxu0 %v5102_v60  ;;  %3943 = vmatpush1.bf16.msra.mxu1 %v4202_v12  ;;  %v4257_v12 = vcombine.high %v394_v54, %v398_v63  ;;  %v446_v54 = vld [vmem:[#allocation7 + $0x370] sm:$0xff]  ;;  %v443_v63 = vld [vmem:[#allocation7 + $0x358] sm:$0xff] }
 0x1b0   :  { %3974 = vmatprep.mubr.bf16.mxu1 %v5102_v60  ;;  %3780 = vmatprep.subr.bf16.mxu0 %v4209_v13  ;;  %v4224_v60 = vcombine.low %v362_v1, %v366_v2  ;;  %v4259_v13 = vcombine.high %v395_v6, %v399_v7  ;;  %v414_v1 = vld [vmem:[#allocation7 + $0x270] sm:$0xff]  ;;  %v411_v2 = vld [vmem:[#allocation7 + $0x258] sm:$0xff] }
 0x1b1   :  { %3944 = vmatprep.subr.bf16.mxu1 %v4211_v15  ;;  %v403_v15 = vld [vmem:[#allocation7 + $0x218] sm:$0xff] }
 0x1b2   :  { %3781 = vmatpush1.bf16.msra.mxu0 %v4208_v18  ;;  %v4258_v18 = vcombine.low %v395_v6, %v399_v7  ;;  %v447_v6 = vld [vmem:[#allocation7 + $0x378] sm:$0xff] }
 0x1b3   :  { %3945 = vmatpush1.bf16.msra.mxu1 %v4210_v61  ;;  %3782 = vmatprep.subr.bf16.mxu0 %v4217_v62  ;;  %v4265_v61 = vcombine.high %v402_v14, %v406_v8  ;;  %v4267_v62 = vcombine.high %v403_v15, %v407_v16  ;;  %v454_v14 = vld [vmem:[#allocation7 + $0x3b0] sm:$0xff]  ;;  %v451_v8 = vld [vmem:[#allocation7 + $0x398] sm:$0xff] }
 0x1b4   :  { %3946 = vmatprep.subr.bf16.mxu1 %v4219_v0  ;;  %v410_v0 = vld [vmem:[#allocation7 + $0x250] sm:$0xff] }
 0x1b5   :  { %v4272_v38 = vcombine.low %v410_v0, %v414_v1 }
 0x1b6   :  { %3783 = vmatpush1.bf16.msra.mxu0 %v4216_v25  ;;  %v4266_v25 = vcombine.low %v403_v15, %v407_v16  ;;  %v455_v15 = vld [vmem:[#allocation7 + $0x3b8] sm:$0xff] }
 0x1b7   :  { %3947 = vmatpush1.bf16.msra.mxu1 %v4218_v27  ;;  %3784 = vmatprep.subr.bf16.mxu0 %v4225_v30  ;;  %v4273_v27 = vcombine.high %v410_v0, %v414_v1  ;;  %v4275_v30 = vcombine.high %v411_v2, %v415_v4  ;;  %v462_v0 = vld [vmem:[#allocation7 + $0x3f0] sm:$0xff]  ;;  %v459_v1 = vld [vmem:[#allocation7 + $0x3d8] sm:$0xff] }
 0x1b8   :  { %3948 = vmatprep.subr.bf16.mxu1 %v4227_v3  ;;  %v418_v3 = vld [vmem:[#allocation7 + $0x290] sm:$0xff] }
 0x1b9   :  { %v4280_v45 = vcombine.low %v418_v3, %v422_v5 }
 0x1ba   :  { %3785 = vmatpush1.bf16.msra.mxu0 %v4224_v60  ;;  %v4274_v60 = vcombine.low %v411_v2, %v415_v4  ;;  %v463_v2 = vld [vmem:[#allocation7 + $0x3f8] sm:$0xff] }
 0x1bb   :  { %3949 = vmatpush1.bf16.msra.mxu1 %v4226_v39  ;;  %3786 = vmatprep.subr.bf16.mxu0 %v4233_v40  ;;  %v4281_v39 = vcombine.high %v418_v3, %v422_v5  ;;  %v4283_v40 = vcombine.high %v419_v34, %v423_v36  ;;  %v470_v3 = vld [vmem:[#allocation7 + $0x430] sm:$0xff]  ;;  %v467_v5 = vld [vmem:[#allocation7 + $0x418] sm:$0xff] }
 0x1bc   :  { %3950 = vmatprep.subr.bf16.mxu1 %v4235_v41  ;;  %v426_v41 = vld [vmem:[#allocation7 + $0x2d0] sm:$0xff] }
 0x1bd   :  { %v4288_v56 = vcombine.low %v426_v41, %v430_v42 }
 0x1be   :  { %3787 = vmatpush1.bf16.msra.mxu0 %v4232_v49  ;;  %v4282_v49 = vcombine.low %v419_v34, %v423_v36  ;;  %v471_v34 = vld [vmem:[#allocation7 + $0x438] sm:$0xff] }
 0x1bf   :  { %3951 = vmatpush1.bf16.msra.mxu1 %v4234_v47  ;;  %3788 = vmatprep.subr.bf16.mxu0 %v4241_v50  ;;  %v4289_v47 = vcombine.high %v426_v41, %v430_v42  ;;  %v4291_v50 = vcombine.high %v427_v43, %v431_v35  ;;  %v478_v41 = vld [vmem:[#allocation7 + $0x470] sm:$0xff] }
 0x1c0   :  { %3952 = vmatprep.subr.bf16.mxu1 %v4243_v52  ;;  %v434_v52 = vld [vmem:[#allocation7 + $0x310] sm:$0xff] }
 0x1c1   :  { %v4296_v7 = vcombine.low %v434_v52, %v438_v48 }
 0x1c2   :  { %3789 = vmatpush1.bf16.msra.mxu0 %v4240_v57  ;;  %v4290_v57 = vcombine.low %v427_v43, %v431_v35  ;;  %v475_v43 = vld [vmem:[#allocation7 + $0x458] sm:$0xff] }
 0x1c3   :  { %3953 = vmatpush1.bf16.msra.mxu1 %v4242_v51  ;;  %3790 = vmatprep.subr.bf16.mxu0 %v4249_v58  ;;  %v4297_v51 = vcombine.high %v434_v52, %v438_v48  ;;  %v4299_v58 = vcombine.high %v435_v53, %v439_v55  ;;  %v479_v35 = vld [vmem:[#allocation7 + $0x478] sm:$0xff] }
 0x1c4   :  { %3954 = vmatprep.subr.bf16.mxu1 %v4251_v59  ;;  %v442_v59 = vld [vmem:[#allocation7 + $0x350] sm:$0xff]  ;;  %v4339_v52 = vcombine.high %v475_v43, %v479_v35  ;;  %v483_v48 = vld [vmem:[#allocation7 + $0x498] sm:$0xff] }
 0x1c5   :  { %v4304_v16 = vcombine.low %v442_v59, %v446_v54 }
 0x1c6   :  { %3791 = vmatpush1.bf16.msra.mxu0 %v4248_v9  ;;  %v4298_v9 = vcombine.low %v435_v53, %v439_v55  ;;  %v487_v53 = vld [vmem:[#allocation7 + $0x4b8] sm:$0xff] }
 0x1c7   :  { %3955 = vmatpush1.bf16.msra.mxu1 %v4250_v10  ;;  %3792 = vmatprep.subr.bf16.mxu0 %v4257_v12  ;;  %v4305_v10 = vcombine.high %v442_v59, %v446_v54  ;;  %v4307_v12 = vcombine.high %v443_v63, %v447_v6  ;;  %v494_v59 = vld [vmem:[#allocation7 + $0x4f0] sm:$0xff]  ;;  %v491_v54 = vld [vmem:[#allocation7 + $0x4d8] sm:$0xff] }
 0x1c8   :  { %3956 = vmatprep.subr.bf16.mxu1 %v4259_v13  ;;  %v450_v13 = vld [vmem:[#allocation7 + $0x390] sm:$0xff] }
 0x1c9   :  { %v4312_v4 = vcombine.low %v450_v13, %v454_v14 }
 0x1ca   :  { %3793 = vmatpush1.bf16.msra.mxu0 %v4256_v17  ;;  %v4306_v17 = vcombine.low %v443_v63, %v447_v6  ;;  %v495_v63 = vld [vmem:[#allocation7 + $0x4f8] sm:$0xff] }
 0x1cb   :  { %3957 = vmatpush1.bf16.msra.mxu1 %v4258_v18  ;;  %3794 = vmatprep.subr.bf16.mxu0 %v4265_v61  ;;  %v4313_v18 = vcombine.high %v450_v13, %v454_v14  ;;  %v4315_v61 = vcombine.high %v451_v8, %v455_v15  ;;  %v499_v13 = vld [vmem:[#allocation7 + $0x518] sm:$0xff] }
 0x1cc   :  { %3958 = vmatprep.subr.bf16.mxu1 %v4267_v62  ;;  %v458_v62 = vld [vmem:[#allocation7 + $0x3d0] sm:$0xff]  ;;  %v503_v14 = vld [vmem:[#allocation7 + $0x538] sm:$0xff] }
 0x1cd   :  { %v4320_v36 = vcombine.low %v458_v62, %v462_v0 }
 0x1ce   :  { %3795 = vmatpush1.bf16.msra.mxu0 %v4264_v19  ;;  %v4314_v19 = vcombine.low %v451_v8, %v455_v15  ;;  %v4354_v8 = vcombine.low %v491_v54, %v495_v63 }
 0x1cf   :  { %3959 = vmatpush1.bf16.msra.mxu1 %v4266_v25  ;;  %3796 = vmatprep.subr.bf16.mxu0 %v4273_v27  ;;  %v4321_v25 = vcombine.high %v458_v62, %v462_v0  ;;  %v4323_v27 = vcombine.high %v459_v1, %v463_v2  ;;  %v511_v62 = vld [vmem:[#allocation7 + $0x578] sm:$0xff] }
 0x1d0   :  { %3960 = vmatprep.subr.bf16.mxu1 %v4275_v30  ;;  %v466_v30 = vld [vmem:[#allocation7 + $0x410] sm:$0xff] }
 0x1d1   :  { %v4328_v42 = vcombine.low %v466_v30, %v470_v3 }
 0x1d2   :  { %3797 = vmatpush1.bf16.msra.mxu0 %v4272_v38  ;;  %v4322_v38 = vcombine.low %v459_v1, %v463_v2  ;;  %v4362_v1 = vcombine.low %v499_v13, %v503_v14 }
 0x1d3   :  { %3961 = vmatpush1.bf16.msra.mxu1 %v4274_v60  ;;  %3798 = vmatprep.subr.bf16.mxu0 %v4281_v39  ;;  %v4329_v60 = vcombine.high %v466_v30, %v470_v3  ;;  %v4331_v39 = vcombine.high %v467_v5, %v471_v34  ;;  %v519_v30 = vld [vmem:[#allocation7 + $0x5b8] sm:$0xff] }
 0x1d4   :  { %3962 = vmatprep.subr.bf16.mxu1 %v4283_v40  ;;  %v474_v40 = vld [vmem:[#allocation7 + $0x450] sm:$0xff] }
 0x1d5   :  { %v4336_v55 = vcombine.low %v474_v40, %v478_v41 }
 0x1d6   :  { %3799 = vmatpush1.bf16.msra.mxu0 %v4280_v45  ;;  %v4330_v45 = vcombine.low %v467_v5, %v471_v34 }
 0x1d7   :  { %3963 = vmatpush1.bf16.msra.mxu1 %v4282_v49  ;;  %3800 = vmatprep.subr.bf16.mxu0 %v4289_v47  ;;  %v4337_v49 = vcombine.high %v474_v40, %v478_v41  ;;  %v482_v47 = vld [vmem:[#allocation7 + $0x490] sm:$0xff]  ;;  %v527_v40 = vld [vmem:[#allocation7 + $0x5f8] sm:$0xff] }
 0x1d8   :  { %3964 = vmatprep.subr.bf16.mxu1 %v4291_v50  ;;  %v486_v50 = vld [vmem:[#allocation7 + $0x4b0] sm:$0xff] }
 0x1d9   :  { %v4344_v6 = vcombine.low %v482_v47, %v486_v50 }
 0x1da   :  { %3801 = vmatpush1.bf16.msra.mxu0 %v4288_v56  ;;  %v4338_v56 = vcombine.low %v475_v43, %v479_v35 }
 0x1db   :  { %3965 = vmatpush1.bf16.msra.mxu1 %v4290_v57  ;;  %3802 = vmatprep.subr.bf16.mxu0 %v4297_v51  ;;  %v4345_v57 = vcombine.high %v482_v47, %v486_v50  ;;  %v4347_v51 = vcombine.high %v483_v48, %v487_v53  ;;  %v531_v47 = vld [vmem:[#allocation7 + $0x618] sm:$0xff] }
 0x1dc   :  { %3966 = vmatprep.subr.bf16.mxu1 %v4299_v58  ;;  %v490_v58 = vld [vmem:[#allocation7 + $0x4d0] sm:$0xff]  ;;  %v535_v50 = vld [vmem:[#allocation7 + $0x638] sm:$0xff] }
 0x1de   :  { %3803 = vmatpush1.bf16.msra.mxu0 %v4296_v7  ;;  %v4353_v7 = vcombine.high %v490_v58, %v494_v59 }
 0x1df   :  { %3967 = vmatpush1.bf16.msra.mxu1 %v4298_v9  ;;  %3804 = vmatprep.subr.bf16.mxu0 %v4305_v10  ;;  %v4355_v9 = vcombine.high %v491_v54, %v495_v63  ;;  %v498_v10 = vld [vmem:[#allocation7 + $0x510] sm:$0xff]  ;;  %v4394_v54 = vcombine.low %v531_v47, %v535_v50 }
 0x1e0   :  { %3968 = vmatprep.subr.bf16.mxu1 %v4307_v12  ;;  %v502_v12 = vld [vmem:[#allocation7 + $0x530] sm:$0xff] }
 0x1e1   :  { %v4361_v15 = vcombine.high %v498_v10, %v502_v12  ;;  %v4360_v0 = vcombine.low %v498_v10, %v502_v12  ;;  %v551_v10 = vld [vmem:[#allocation7 + $0x6b8] sm:$0xff] }
 0x1e2   :  { %3805 = vmatpush1.bf16.msra.mxu0 %v4304_v16  ;;  %v4363_v16 = vcombine.high %v499_v13, %v503_v14 }
 0x1e3   :  { %3969 = vmatpush1.bf16.msra.mxu1 %v4306_v17  ;;  %3806 = vmatprep.subr.bf16.mxu0 %v4313_v18  ;;  %v506_v17 = vld [vmem:[#allocation7 + $0x550] sm:$0xff] }
 0x1e4   :  { %3970 = vmatprep.subr.bf16.mxu1 %v4315_v61  ;;  %v510_v18 = vld [vmem:[#allocation7 + $0x570] sm:$0xff]  ;;  %v507_v61 = vld [vmem:[#allocation7 + $0x558] sm:$0xff] }
 0x1e5   :  { %v4369_v2 = vcombine.high %v506_v17, %v510_v18  ;;  %v4368_v3 = vcombine.low %v506_v17, %v510_v18  ;;  %v4370_v5 = vcombine.low %v507_v61, %v511_v62  ;;  %v559_v17 = vld [vmem:[#allocation7 + $0x6f8] sm:$0xff] }
 0x1e6   :  { %3807 = vmatpush1.bf16.msra.mxu0 %v4312_v4  ;;  %v4371_v4 = vcombine.high %v507_v61, %v511_v62 }
 0x1e7   :  { %3971 = vmatpush1.bf16.msra.mxu1 %v4314_v19  ;;  %3808 = vmatprep.subr.bf16.mxu0 %v4321_v25  ;;  %v514_v19 = vld [vmem:[#allocation7 + $0x590] sm:$0xff] }
 0x1e8   :  { %3972 = vmatprep.subr.bf16.mxu1 %v4323_v27  ;;  %v518_v25 = vld [vmem:[#allocation7 + $0x5b0] sm:$0xff]  ;;  %v515_v27 = vld [vmem:[#allocation7 + $0x598] sm:$0xff] }
 0x1e9   :  { %v4377_v34 = vcombine.high %v514_v19, %v518_v25  ;;  %v4376_v41 = vcombine.low %v514_v19, %v518_v25  ;;  %v567_v19 = vld [vmem:[#allocation7 + $0x738] sm:$0xff] }
 0x1ea   :  { %3809 = vmatpush1.bf16.msra.mxu0 %v4320_v36  ;;  %v4379_v36 = vcombine.high %v515_v27, %v519_v30 }
 0x1eb   :  { %3973 = vmatpush1.bf16.msra.mxu1 %v4322_v38  ;;  %3819 = vmatprep.subr.bf16.mxu0 %v4329_v60  ;;  %v522_v38 = vld [vmem:[#allocation7 + $0x5d0] sm:$0xff] }
 0x1ec   :  { %3983 = vmatprep.subr.bf16.mxu1 %v4331_v39  ;;  %v526_v60 = vld [vmem:[#allocation7 + $0x5f0] sm:$0xff]  ;;  %v523_v39 = vld [vmem:[#allocation7 + $0x5d8] sm:$0xff] }
 0x1ed   :  { %3811 = vmatmul.mubr.bf16.vlgmr.msra.gmra.mrb[4].mxu0 %v5104_v37  ;;  %v4385_v43 = vcombine.high %v522_v38, %v526_v60  ;;  %v4387_v35 = vcombine.high %v523_v39, %v527_v40 }
 0x1ee   :  { %3975 = vmatmul.mubr.bf16.vlgmr.msra.gmra.mrb[4].mxu1 %v5104_v37  ;;  %3820 = vmatpush1.bf16.msra.mxu0 %v4328_v42  ;;  %v4346_v37 = vcombine.low %v483_v48, %v487_v53  ;;  %v4378_v42 = vcombine.low %v515_v27, %v519_v30  ;;  %v4386_v48 = vcombine.low %v523_v39, %v527_v40 }
 0x1ef   :  { %3851 = vmatprep.mubr.bf16.mxu0 %v5116_v29  ;;  %3984 = vmatpush1.bf16.msra.mxu1 %v4330_v45  ;;  %v530_v45 = vld [vmem:[#allocation7 + $0x610] sm:$0xff] }
 0x1f0   :  { %4015 = vmatprep.mubr.bf16.mxu1 %v5116_v29  ;;  %3821 = vmatprep.subr.bf16.mxu0 %v4337_v49  ;;  %v4352_v29 = vcombine.low %v490_v58, %v494_v59  ;;  %v534_v49 = vld [vmem:[#allocation7 + $0x630] sm:$0xff]  ;;  %v543_v58 = vld [vmem:[#allocation7 + $0x678] sm:$0xff] }
 0x1f1   :  { %3985 = vmatprep.subr.bf16.mxu1 %v4339_v52  ;;  %v4384_v52 = vcombine.low %v522_v38, %v526_v60  ;;  %v4393_v53 = vcombine.high %v530_v45, %v534_v49  ;;  %v4392_v59 = vcombine.low %v530_v45, %v534_v49  ;;  %v575_v38 = vld [vmem:[#allocation7 + $0x778] sm:$0xff] }
 0x1f2   :  { %3822 = vmatpush1.bf16.msra.mxu0 %v4336_v55  ;;  %v4395_v55 = vcombine.high %v531_v47, %v535_v50  ;;  %v583_v45 = vld [vmem:[#allocation7 + $0x7b8] sm:$0xff] }
 0x1f3   :  { %3986 = vmatpush1.bf16.msra.mxu1 %v4338_v56  ;;  %3823 = vmatprep.subr.bf16.mxu0 %v4345_v57  ;;  %v538_v56 = vld [vmem:[#allocation7 + $0x650] sm:$0xff] }
 0x1f4   :  { %3987 = vmatprep.subr.bf16.mxu1 %v4347_v51  ;;  %v542_v57 = vld [vmem:[#allocation7 + $0x670] sm:$0xff]  ;;  %v539_v51 = vld [vmem:[#allocation7 + $0x658] sm:$0xff] }
 0x1f5   :  { %v4401_v63 = vcombine.high %v538_v56, %v542_v57  ;;  %v4400_v12 = vcombine.low %v538_v56, %v542_v57  ;;  %v4402_v13 = vcombine.low %v539_v51, %v543_v58  ;;  %v591_v56 = vld [vmem:[#allocation7 + $0x7f8] sm:$0xff] }
 0x1f6   :  { %3824 = vmatpush1.bf16.msra.mxu0 %v4344_v6  ;;  %v4403_v6 = vcombine.high %v539_v51, %v543_v58 }
 0x1f7   :  { %3988 = vmatpush1.bf16.msra.mxu1 %v4346_v37  ;;  %3825 = vmatprep.subr.bf16.mxu0 %v4353_v7  ;;  %v546_v37 = vld [vmem:[#allocation7 + $0x690] sm:$0xff] }
 0x1f8   :  { %3989 = vmatprep.subr.bf16.mxu1 %v4355_v9  ;;  %v550_v7 = vld [vmem:[#allocation7 + $0x6b0] sm:$0xff]  ;;  %v547_v9 = vld [vmem:[#allocation7 + $0x698] sm:$0xff] }
 0x1f9   :  { %v4409_v14 = vcombine.high %v546_v37, %v550_v7  ;;  %v4408_v18 = vcombine.low %v546_v37, %v550_v7  ;;  %v4410_v61 = vcombine.low %v547_v9, %v551_v10  ;;  %v599_v37 = vld [vmem:[#allocation7 + $0x838] sm:$0xff] }
 0x1fa   :  { %3826 = vmatpush1.bf16.msra.mxu0 %v4352_v29  ;;  %v4411_v29 = vcombine.high %v547_v9, %v551_v10 }
 0x1fb   :  { %3990 = vmatpush1.bf16.msra.mxu1 %v4354_v8  ;;  %3827 = vmatprep.subr.bf16.mxu0 %v4361_v15  ;;  %v554_v8 = vld [vmem:[#allocation7 + $0x6d0] sm:$0xff] }
 0x1fc   :  { %3991 = vmatprep.subr.bf16.mxu1 %v4363_v16  ;;  %v558_v15 = vld [vmem:[#allocation7 + $0x6f0] sm:$0xff]  ;;  %v555_v16 = vld [vmem:[#allocation7 + $0x6d8] sm:$0xff] }
 0x1fd   :  { %v4417_v62 = vcombine.high %v554_v8, %v558_v15  ;;  %v4416_v25 = vcombine.low %v554_v8, %v558_v15  ;;  %v4418_v27 = vcombine.low %v555_v16, %v559_v17  ;;  %v603_v8 = vld [vmem:[#allocation7 + $0x858] sm:$0xff] }
 0x1fe   :  { %3828 = vmatpush1.bf16.msra.mxu0 %v4360_v0  ;;  %v4419_v0 = vcombine.high %v555_v16, %v559_v17  ;;  %v607_v15 = vld [vmem:[#allocation7 + $0x878] sm:$0xff] }
 0x1ff   :  { %3992 = vmatpush1.bf16.msra.mxu1 %v4362_v1  ;;  %3829 = vmatprep.subr.bf16.mxu0 %v4369_v2  ;;  %v562_v1 = vld [vmem:[#allocation7 + $0x710] sm:$0xff] }
 0x200   :  { %3993 = vmatprep.subr.bf16.mxu1 %v4371_v4  ;;  %v566_v2 = vld [vmem:[#allocation7 + $0x730] sm:$0xff]  ;;  %v563_v4 = vld [vmem:[#allocation7 + $0x718] sm:$0xff] }
 0x201   :  { %v4425_v30 = vcombine.high %v562_v1, %v566_v2  ;;  %v4424_v60 = vcombine.low %v562_v1, %v566_v2  ;;  %v4426_v39 = vcombine.low %v563_v4, %v567_v19  ;;  %v615_v1 = vld [vmem:[#allocation7 + $0x8b8] sm:$0xff] }
 0x202   :  { %3830 = vmatpush1.bf16.msra.mxu0 %v4368_v3  ;;  %v4427_v3 = vcombine.high %v563_v4, %v567_v19  ;;  %v4466_v4 = vcombine.low %v603_v8, %v607_v15 }
 0x203   :  { %3994 = vmatpush1.bf16.msra.mxu1 %v4370_v5  ;;  %3831 = vmatprep.subr.bf16.mxu0 %v4377_v34  ;;  %v570_v5 = vld [vmem:[#allocation7 + $0x750] sm:$0xff] }
 0x204   :  { %3995 = vmatprep.subr.bf16.mxu1 %v4379_v36  ;;  %v574_v34 = vld [vmem:[#allocation7 + $0x770] sm:$0xff]  ;;  %v571_v36 = vld [vmem:[#allocation7 + $0x758] sm:$0xff] }
 0x205   :  { %v4433_v40 = vcombine.high %v570_v5, %v574_v34  ;;  %v4432_v49 = vcombine.low %v570_v5, %v574_v34  ;;  %v4434_v47 = vcombine.low %v571_v36, %v575_v38  ;;  %v623_v5 = vld [vmem:[#allocation7 + $0x8f8] sm:$0xff] }
 0x206   :  { %3832 = vmatpush1.bf16.msra.mxu0 %v4376_v41  ;;  %v4435_v41 = vcombine.high %v571_v36, %v575_v38 }
 0x207   :  { %3996 = vmatpush1.bf16.msra.mxu1 %v4378_v42  ;;  %3833 = vmatprep.subr.bf16.mxu0 %v4385_v43  ;;  %v578_v42 = vld [vmem:[#allocation7 + $0x790] sm:$0xff] }
 0x208   :  { %3997 = vmatprep.subr.bf16.mxu1 %v4387_v35  ;;  %v582_v43 = vld [vmem:[#allocation7 + $0x7b0] sm:$0xff]  ;;  %v579_v35 = vld [vmem:[#allocation7 + $0x798] sm:$0xff] }
 0x209   :  { %v4441_v50 = vcombine.high %v578_v42, %v582_v43  ;;  %v4440_v57 = vcombine.low %v578_v42, %v582_v43  ;;  %v4442_v51 = vcombine.low %v579_v35, %v583_v45 }
 0x20a   :  { %3834 = vmatpush1.bf16.msra.mxu0 %v4384_v52  ;;  %v4443_v52 = vcombine.high %v579_v35, %v583_v45  ;;  %v634_v45 = vld [vmem:[#allocation7 + $0x950] sm:$0xff] }
 0x20b   :  { %3998 = vmatpush1.bf16.msra.mxu1 %v4386_v48  ;;  %3835 = vmatprep.subr.bf16.mxu0 %v4393_v53  ;;  %v586_v48 = vld [vmem:[#allocation7 + $0x7d0] sm:$0xff] }
 0x20c   :  { %3999 = vmatprep.subr.bf16.mxu1 %v4395_v55  ;;  %v590_v53 = vld [vmem:[#allocation7 + $0x7f0] sm:$0xff]  ;;  %v587_v55 = vld [vmem:[#allocation7 + $0x7d8] sm:$0xff] }
 0x20d   :  { %v4449_v58 = vcombine.high %v586_v48, %v590_v53  ;;  %v4448_v7 = vcombine.low %v586_v48, %v590_v53  ;;  %v4450_v9 = vcombine.low %v587_v55, %v591_v56 }
 0x20e   :  { %3836 = vmatpush1.bf16.msra.mxu0 %v4392_v59  ;;  %v4451_v59 = vcombine.high %v587_v55, %v591_v56  ;;  %v642_v56 = vld [vmem:[#allocation7 + $0x990] sm:$0xff] }
 0x20f   :  { %4000 = vmatpush1.bf16.msra.mxu1 %v4394_v54  ;;  %3837 = vmatprep.subr.bf16.mxu0 %v4401_v63  ;;  %v594_v54 = vld [vmem:[#allocation7 + $0x810] sm:$0xff] }
 0x210   :  { %4001 = vmatprep.subr.bf16.mxu1 %v4403_v6  ;;  %v598_v63 = vld [vmem:[#allocation7 + $0x830] sm:$0xff]  ;;  %v595_v6 = vld [vmem:[#allocation7 + $0x818] sm:$0xff] }
 0x211   :  { %v4457_v10 = vcombine.high %v594_v54, %v598_v63  ;;  %v4458_v16 = vcombine.low %v595_v6, %v599_v37 }
 0x212   :  { %3838 = vmatpush1.bf16.msra.mxu0 %v4400_v12  ;;  %v4459_v12 = vcombine.high %v595_v6, %v599_v37  ;;  %v650_v37 = vld [vmem:[#allocation7 + $0x9d0] sm:$0xff] }
 0x213   :  { %4002 = vmatpush1.bf16.msra.mxu1 %v4402_v13  ;;  %3839 = vmatprep.subr.bf16.mxu0 %v4409_v14  ;;  %v602_v13 = vld [vmem:[#allocation7 + $0x850] sm:$0xff] }
 0x214   :  { %4003 = vmatprep.subr.bf16.mxu1 %v4411_v29  ;;  %v606_v14 = vld [vmem:[#allocation7 + $0x870] sm:$0xff]  ;;  %v4456_v29 = vcombine.low %v594_v54, %v598_v63 }
 0x215   :  { %v4465_v17 = vcombine.high %v602_v13, %v606_v14  ;;  %v4464_v2 = vcombine.low %v602_v13, %v606_v14 }
 0x216   :  { %3840 = vmatpush1.bf16.msra.mxu0 %v4408_v18  ;;  %v610_v18 = vld [vmem:[#allocation7 + $0x890] sm:$0xff] }
 0x217   :  { %4004 = vmatpush1.bf16.msra.mxu1 %v4410_v61  ;;  %3841 = vmatprep.subr.bf16.mxu0 %v4417_v62  ;;  %v614_v61 = vld [vmem:[#allocation7 + $0x8b0] sm:$0xff]  ;;  %v4467_v62 = vcombine.high %v603_v8, %v607_v15 }
 0x218   :  { %4005 = vmatprep.subr.bf16.mxu1 %v4419_v0  ;;  %v611_v0 = vld [vmem:[#allocation7 + $0x898] sm:$0xff]  ;;  %v4473_v19 = vcombine.high %v610_v18, %v614_v61  ;;  %v4472_v34 = vcombine.low %v610_v18, %v614_v61  ;;  %v658_v8 = vld [vmem:[#allocation7 + $0xa10] sm:$0xff] }
 0x219   :  { %v662_v15 = vld [vmem:[#allocation7 + $0xa30] sm:$0xff] }
 0x21a   :  { %3842 = vmatpush1.bf16.msra.mxu0 %v4416_v25  ;;  %v4475_v25 = vcombine.high %v611_v0, %v615_v1 }
 0x21b   :  { %4006 = vmatpush1.bf16.msra.mxu1 %v4418_v27  ;;  %3843 = vmatprep.subr.bf16.mxu0 %v4425_v30  ;;  %v618_v27 = vld [vmem:[#allocation7 + $0x8d0] sm:$0xff] }
 0x21c   :  { %4007 = vmatprep.subr.bf16.mxu1 %v4427_v3  ;;  %v622_v30 = vld [vmem:[#allocation7 + $0x8f0] sm:$0xff]  ;;  %v619_v3 = vld [vmem:[#allocation7 + $0x8d8] sm:$0xff] }
 0x21d   :  { %v4481_v36 = vcombine.high %v618_v27, %v622_v30  ;;  %v4483_v38 = vcombine.high %v619_v3, %v623_v5  ;;  %v4482_v42 = vcombine.low %v619_v3, %v623_v5  ;;  %v674_v5 = vld [vmem:[#allocation7 + $0xa90] sm:$0xff] }
 0x21e   :  { %3844 = vmatpush1.bf16.msra.mxu0 %v4424_v60  ;;  %v626_v60 = vld [vmem:[#allocation7 + $0x910] sm:$0xff] }
 0x21f   :  { %4008 = vmatpush1.bf16.msra.mxu1 %v4426_v39  ;;  %3845 = vmatprep.subr.bf16.mxu0 %v4433_v40  ;;  %v630_v39 = vld [vmem:[#allocation7 + $0x930] sm:$0xff]  ;;  %v627_v40 = vld [vmem:[#allocation7 + $0x918] sm:$0xff] }
 0x220   :  { %4009 = vmatprep.subr.bf16.mxu1 %v4435_v41  ;;  %v631_v41 = vld [vmem:[#allocation7 + $0x938] sm:$0xff]  ;;  %v4489_v43 = vcombine.high %v626_v60, %v630_v39 }
 0x221   :  { %v4491_v35 = vcombine.high %v627_v40, %v631_v41  ;;  %v4490_v48 = vcombine.low %v627_v40, %v631_v41  ;;  %v682_v41 = vld [vmem:[#allocation7 + $0xad0] sm:$0xff] }
 0x222   :  { %3846 = vmatpush1.bf16.msra.mxu0 %v4432_v49  ;;  %v638_v49 = vld [vmem:[#allocation7 + $0x970] sm:$0xff] }
 0x223   :  { %4010 = vmatpush1.bf16.msra.mxu1 %v4434_v47  ;;  %3847 = vmatprep.subr.bf16.mxu0 %v4441_v50  ;;  %v635_v47 = vld [vmem:[#allocation7 + $0x958] sm:$0xff]  ;;  %v4497_v53 = vcombine.high %v634_v45, %v638_v49 }
 0x224   :  { %4011 = vmatprep.subr.bf16.mxu1 %v4443_v52  ;;  %v639_v50 = vld [vmem:[#allocation7 + $0x978] sm:$0xff]  ;;  %v4488_v52 = vcombine.low %v626_v60, %v630_v39 }
 0x225   :  { %v4499_v55 = vcombine.high %v635_v47, %v639_v50  ;;  %v4498_v54 = vcombine.low %v635_v47, %v639_v50  ;;  %v690_v50 = vld [vmem:[#allocation7 + $0xb10] sm:$0xff] }
 0x226   :  { %3848 = vmatpush1.bf16.msra.mxu0 %v4440_v57  ;;  %v646_v57 = vld [vmem:[#allocation7 + $0x9b0] sm:$0xff] }
 0x227   :  { %4012 = vmatpush1.bf16.msra.mxu1 %v4442_v51  ;;  %3849 = vmatprep.subr.bf16.mxu0 %v4449_v58  ;;  %v643_v51 = vld [vmem:[#allocation7 + $0x998] sm:$0xff]  ;;  %v4505_v63 = vcombine.high %v642_v56, %v646_v57 }
 0x228   :  { %4013 = vmatprep.subr.bf16.mxu1 %v4451_v59  ;;  %v647_v58 = vld [vmem:[#allocation7 + $0x9b8] sm:$0xff]  ;;  %v4496_v59 = vcombine.low %v634_v45, %v638_v49 }
 0x229   :  { %v4507_v6 = vcombine.high %v643_v51, %v647_v58  ;;  %v4506_v13 = vcombine.low %v643_v51, %v647_v58  ;;  %v698_v58 = vld [vmem:[#allocation7 + $0xb50] sm:$0xff] }
 0x22a   :  { %3850 = vmatpush1.bf16.msra.mxu0 %v4448_v7  ;;  %v654_v7 = vld [vmem:[#allocation7 + $0x9f0] sm:$0xff] }
 0x22b   :  { %4014 = vmatpush1.bf16.msra.mxu1 %v4450_v9  ;;  %3860 = vmatprep.subr.bf16.mxu0 %v4457_v10  ;;  %v651_v9 = vld [vmem:[#allocation7 + $0x9d8] sm:$0xff]  ;;  %v4513_v14 = vcombine.high %v650_v37, %v654_v7  ;;  %v4512_v18 = vcombine.low %v650_v37, %v654_v7 }
 0x22c   :  { %4024 = vmatprep.subr.bf16.mxu1 %v4459_v12  ;;  %v655_v10 = vld [vmem:[#allocation7 + $0x9f8] sm:$0xff]  ;;  %v4504_v12 = vcombine.low %v642_v56, %v646_v57 }
 0x22d   :  { %3852 = vmatmul.mubr.bf16.vlgmr.msra.gmra.mrb[4].mxu0 %v5130_v44  ;;  %v4514_v61 = vcombine.low %v651_v9, %v655_v10 }
 0x22e   :  { %4016 = vmatmul.mubr.bf16.vlgmr.msra.gmra.mrb[4].mxu1 %v5130_v44  ;;  %3861 = vmatpush1.bf16.msra.mxu0 %v4456_v29  ;;  %v4474_v44 = vcombine.low %v611_v0, %v615_v1  ;;  %v4515_v29 = vcombine.high %v651_v9, %v655_v10  ;;  %v666_v1 = vld [vmem:[#allocation7 + $0xa50] sm:$0xff] }
 0x22f   :  { %3892 = vmatprep.mubr.bf16.mxu0 %v5132_v46  ;;  %4025 = vmatpush1.bf16.msra.mxu1 %v4458_v16  ;;  %v659_v16 = vld [vmem:[#allocation7 + $0xa18] sm:$0xff]  ;;  %v706_v10 = vld [vmem:[#allocation7 + $0xb90] sm:$0xff] }
 0x230   :  { %4056 = vmatprep.mubr.bf16.mxu1 %v5132_v46  ;;  %3862 = vmatprep.subr.bf16.mxu0 %v4465_v17  ;;  %v4480_v46 = vcombine.low %v618_v27, %v622_v30  ;;  %v663_v17 = vld [vmem:[#allocation7 + $0xa38] sm:$0xff] }
 0x231   :  { %4026 = vmatprep.subr.bf16.mxu1 %v4467_v62  ;;  %v4521_v62 = vcombine.high %v658_v8, %v662_v15  ;;  %v4523_v0 = vcombine.high %v659_v16, %v663_v17  ;;  %v4522_v27 = vcombine.low %v659_v16, %v663_v17  ;;  %v714_v17 = vld [vmem:[#allocation7 + $0xbd0] sm:$0xff] }
 0x232   :  { %3863 = vmatpush1.bf16.msra.mxu0 %v4464_v2  ;;  %v670_v2 = vld [vmem:[#allocation7 + $0xa70] sm:$0xff] }
 0x233   :  { %4027 = vmatpush1.bf16.msra.mxu1 %v4466_v4  ;;  %3864 = vmatprep.subr.bf16.mxu0 %v4473_v19  ;;  %v667_v4 = vld [vmem:[#allocation7 + $0xa58] sm:$0xff]  ;;  %v4529_v30 = vcombine.high %v666_v1, %v670_v2 }
 0x234   :  { %4028 = vmatprep.subr.bf16.mxu1 %v4475_v25  ;;  %v671_v19 = vld [vmem:[#allocation7 + $0xa78] sm:$0xff]  ;;  %v4520_v25 = vcombine.low %v658_v8, %v662_v15 }
 0x235   :  { %v4531_v3 = vcombine.high %v667_v4, %v671_v19  ;;  %v4530_v60 = vcombine.low %v667_v4, %v671_v19  ;;  %v722_v19 = vld [vmem:[#allocation7 + $0xc10] sm:$0xff] }
 0x236   :  { %3865 = vmatpush1.bf16.msra.mxu0 %v4472_v34  ;;  %v678_v34 = vld [vmem:[#allocation7 + $0xab0] sm:$0xff] }
 0x237   :  { %4029 = vmatpush1.bf16.msra.mxu1 %v4474_v44  ;;  %3866 = vmatprep.subr.bf16.mxu0 %v4481_v36  ;;  %v675_v44 = vld [vmem:[#allocation7 + $0xa98] sm:$0xff]  ;;  %v4537_v39 = vcombine.high %v674_v5, %v678_v34 }
 0x238   :  { %4030 = vmatprep.subr.bf16.mxu1 %v4483_v38  ;;  %v679_v36 = vld [vmem:[#allocation7 + $0xab8] sm:$0xff]  ;;  %v4528_v38 = vcombine.low %v666_v1, %v670_v2 }
 0x239   :  { %v4539_v40 = vcombine.high %v675_v44, %v679_v36  ;;  %v4538_v45 = vcombine.low %v675_v44, %v679_v36  ;;  %v730_v36 = vld [vmem:[#allocation7 + $0xc50] sm:$0xff] }
 0x23a   :  { %3867 = vmatpush1.bf16.msra.mxu0 %v4480_v46  ;;  %v686_v46 = vld [vmem:[#allocation7 + $0xaf0] sm:$0xff] }
 0x23b   :  { %4031 = vmatpush1.bf16.msra.mxu1 %v4482_v42  ;;  %3868 = vmatprep.subr.bf16.mxu0 %v4489_v43  ;;  %v683_v42 = vld [vmem:[#allocation7 + $0xad8] sm:$0xff]  ;;  %v4545_v49 = vcombine.high %v682_v41, %v686_v46 }
 0x23c   :  { %4032 = vmatprep.subr.bf16.mxu1 %v4491_v35  ;;  %v687_v43 = vld [vmem:[#allocation7 + $0xaf8] sm:$0xff]  ;;  %v4536_v35 = vcombine.low %v674_v5, %v678_v34 }
 0x23d   :  { %v4547_v47 = vcombine.high %v683_v42, %v687_v43  ;;  %v4546_v56 = vcombine.low %v683_v42, %v687_v43  ;;  %v738_v42 = vld [vmem:[#allocation7 + $0xc90] sm:$0xff] }
 0x23e   :  { %3869 = vmatpush1.bf16.msra.mxu0 %v4488_v52  ;;  %v694_v52 = vld [vmem:[#allocation7 + $0xb30] sm:$0xff] }
 0x23f   :  { %4033 = vmatpush1.bf16.msra.mxu1 %v4490_v48  ;;  %3870 = vmatprep.subr.bf16.mxu0 %v4497_v53  ;;  %v691_v48 = vld [vmem:[#allocation7 + $0xb18] sm:$0xff]  ;;  %v4553_v57 = vcombine.high %v690_v50, %v694_v52  ;;  %v742_v43 = vld [vmem:[#allocation7 + $0xcb0] sm:$0xff] }
 0x240   :  { %4034 = vmatprep.subr.bf16.mxu1 %v4499_v55  ;;  %v695_v53 = vld [vmem:[#allocation7 + $0xb38] sm:$0xff]  ;;  %v4544_v55 = vcombine.low %v682_v41, %v686_v46 }
 0x241   :  { %v4555_v51 = vcombine.high %v691_v48, %v695_v53  ;;  %v4554_v37 = vcombine.low %v691_v48, %v695_v53  ;;  %v746_v53 = vld [vmem:[#allocation7 + $0xcd0] sm:$0xff] }
 0x242   :  { %3871 = vmatpush1.bf16.msra.mxu0 %v4496_v59  ;;  %v702_v59 = vld [vmem:[#allocation7 + $0xb70] sm:$0xff] }
 0x243   :  { %4035 = vmatpush1.bf16.msra.mxu1 %v4498_v54  ;;  %3872 = vmatprep.subr.bf16.mxu0 %v4505_v63  ;;  %v699_v54 = vld [vmem:[#allocation7 + $0xb58] sm:$0xff]  ;;  %v4561_v7 = vcombine.high %v698_v58, %v702_v59 }
 0x244   :  { %4036 = vmatprep.subr.bf16.mxu1 %v4507_v6  ;;  %v703_v63 = vld [vmem:[#allocation7 + $0xb78] sm:$0xff]  ;;  %v4552_v6 = vcombine.low %v690_v50, %v694_v52  ;;  %v4601_v52 = vcombine.high %v738_v42, %v742_v43 }
 0x245   :  { %v4563_v9 = vcombine.high %v699_v54, %v703_v63  ;;  %v4562_v8 = vcombine.low %v699_v54, %v703_v63  ;;  %v754_v54 = vld [vmem:[#allocation7 + $0xd10] sm:$0xff] }
 0x246   :  { %3873 = vmatpush1.bf16.msra.mxu0 %v4504_v12  ;;  %v710_v12 = vld [vmem:[#allocation7 + $0xbb0] sm:$0xff] }
 0x247   :  { %4037 = vmatpush1.bf16.msra.mxu1 %v4506_v13  ;;  %3874 = vmatprep.subr.bf16.mxu0 %v4513_v14  ;;  %v707_v13 = vld [vmem:[#allocation7 + $0xb98] sm:$0xff]  ;;  %v4569_v15 = vcombine.high %v706_v10, %v710_v12  ;;  %v758_v63 = vld [vmem:[#allocation7 + $0xd30] sm:$0xff] }
 0x248   :  { %4038 = vmatprep.subr.bf16.mxu1 %v4515_v29  ;;  %v711_v14 = vld [vmem:[#allocation7 + $0xbb8] sm:$0xff]  ;;  %v4560_v29 = vcombine.low %v698_v58, %v702_v59 }
 0x249   :  { %v4571_v16 = vcombine.high %v707_v13, %v711_v14  ;;  %v4570_v1 = vcombine.low %v707_v13, %v711_v14  ;;  %v766_v13 = vld [vmem:[#allocation7 + $0xd70] sm:$0xff]  ;;  %v763_v14 = vld [vmem:[#allocation7 + $0xd58] sm:$0xff] }
 0x24a   :  { %3875 = vmatpush1.bf16.msra.mxu0 %v4512_v18  ;;  %v718_v18 = vld [vmem:[#allocation7 + $0xbf0] sm:$0xff] }
 0x24b   :  { %4039 = vmatpush1.bf16.msra.mxu1 %v4514_v61  ;;  %3876 = vmatprep.subr.bf16.mxu0 %v4521_v62  ;;  %v715_v61 = vld [vmem:[#allocation7 + $0xbd8] sm:$0xff]  ;;  %v4577_v2 = vcombine.high %v714_v17, %v718_v18 }
 0x24c   :  { %4040 = vmatprep.subr.bf16.mxu1 %v4523_v0  ;;  %v719_v62 = vld [vmem:[#allocation7 + $0xbf8] sm:$0xff]  ;;  %v4568_v0 = vcombine.low %v706_v10, %v710_v12  ;;  %v762_v12 = vld [vmem:[#allocation7 + $0xd50] sm:$0xff] }
 0x24d   :  { %v4579_v4 = vcombine.high %v715_v61, %v719_v62  ;;  %v4578_v5 = vcombine.low %v715_v61, %v719_v62  ;;  %v770_v61 = vld [vmem:[#allocation7 + $0xd90] sm:$0xff] }
 0x24e   :  { %3877 = vmatpush1.bf16.msra.mxu0 %v4520_v25  ;;  %v726_v25 = vld [vmem:[#allocation7 + $0xc30] sm:$0xff] }
 0x24f   :  { %4041 = vmatpush1.bf16.msra.mxu1 %v4522_v27  ;;  %3878 = vmatprep.subr.bf16.mxu0 %v4529_v30  ;;  %v723_v27 = vld [vmem:[#allocation7 + $0xc18] sm:$0xff]  ;;  %v4585_v34 = vcombine.high %v722_v19, %v726_v25  ;;  %v774_v62 = vld [vmem:[#allocation7 + $0xdb0] sm:$0xff] }
 0x250   :  { %4042 = vmatprep.subr.bf16.mxu1 %v4531_v3  ;;  %v727_v30 = vld [vmem:[#allocation7 + $0xc38] sm:$0xff]  ;;  %v4576_v3 = vcombine.low %v714_v17, %v718_v18  ;;  %v4625_v17 = vcombine.high %v762_v12, %v766_v13 }
 0x251   :  { %v4587_v44 = vcombine.high %v723_v27, %v727_v30  ;;  %v4586_v41 = vcombine.low %v723_v27, %v727_v30  ;;  %v4624_v27 = vcombine.low %v762_v12, %v766_v13 }
 0x252   :  { %3879 = vmatpush1.bf16.msra.mxu0 %v4528_v38  ;;  %v734_v38 = vld [vmem:[#allocation7 + $0xc70] sm:$0xff] }
 0x253   :  { %4043 = vmatpush1.bf16.msra.mxu1 %v4530_v60  ;;  %3880 = vmatprep.subr.bf16.mxu0 %v4537_v39  ;;  %v4584_v60 = vcombine.low %v722_v19, %v726_v25  ;;  %v731_v39 = vld [vmem:[#allocation7 + $0xc58] sm:$0xff]  ;;  %v4593_v46 = vcombine.high %v730_v36, %v734_v38 }
 0x254   :  { %4044 = vmatprep.subr.bf16.mxu1 %v4539_v40  ;;  %v735_v40 = vld [vmem:[#allocation7 + $0xc78] sm:$0xff] }
 0x255   :  { %v4594_v50 = vcombine.low %v731_v39, %v735_v40 }
 0x256   :  { %3881 = vmatpush1.bf16.msra.mxu0 %v4536_v35  ;;  %v4595_v35 = vcombine.high %v731_v39, %v735_v40 }
 0x257   :  { %4045 = vmatpush1.bf16.msra.mxu1 %v4538_v45  ;;  %3882 = vmatprep.subr.bf16.mxu0 %v4545_v49  ;;  %v739_v45 = vld [vmem:[#allocation7 + $0xc98] sm:$0xff] }
 0x258   :  { %4046 = vmatprep.subr.bf16.mxu1 %v4547_v47  ;;  %v743_v49 = vld [vmem:[#allocation7 + $0xcb8] sm:$0xff]  ;;  %v4592_v47 = vcombine.low %v730_v36, %v734_v38  ;;  %v778_v36 = vld [vmem:[#allocation7 + $0xdd0] sm:$0xff] }
 0x259   :  { %v4603_v48 = vcombine.high %v739_v45, %v743_v49  ;;  %v782_v38 = vld [vmem:[#allocation7 + $0xdf0] sm:$0xff] }
 0x25a   :  { %3883 = vmatpush1.bf16.msra.mxu0 %v4544_v55  ;;  %v750_v55 = vld [vmem:[#allocation7 + $0xcf0] sm:$0xff] }
 0x25b   :  { %4047 = vmatpush1.bf16.msra.mxu1 %v4546_v56  ;;  %3884 = vmatprep.subr.bf16.mxu0 %v4553_v57  ;;  %v747_v56 = vld [vmem:[#allocation7 + $0xcd8] sm:$0xff]  ;;  %v4609_v58 = vcombine.high %v746_v53, %v750_v55 }
 0x25c   :  { %4048 = vmatprep.subr.bf16.mxu1 %v4555_v51  ;;  %v751_v57 = vld [vmem:[#allocation7 + $0xcf8] sm:$0xff]  ;;  %v4600_v51 = vcombine.low %v738_v42, %v742_v43 }
 0x25d   :  { %v4611_v59 = vcombine.high %v747_v56, %v751_v57  ;;  %v783_v42 = vld [vmem:[#allocation7 + $0xdf8] sm:$0xff] }
 0x25e   :  { %3885 = vmatpush1.bf16.msra.mxu0 %v4552_v6  ;;  %v755_v6 = vld [vmem:[#allocation7 + $0xd18] sm:$0xff] }
 0x25f   :  { %4049 = vmatpush1.bf16.msra.mxu1 %v4554_v37  ;;  %3886 = vmatprep.subr.bf16.mxu0 %v4561_v7  ;;  %v759_v37 = vld [vmem:[#allocation7 + $0xd38] sm:$0xff]  ;;  %v4610_v7 = vcombine.low %v747_v56, %v751_v57  ;;  %v4641_v56 = vcombine.high %v778_v36, %v782_v38 }
 0x260   :  { %4050 = vmatprep.subr.bf16.mxu1 %v4563_v9  ;;  %v4617_v9 = vcombine.high %v754_v54, %v758_v63  ;;  %v4619_v10 = vcombine.high %v755_v6, %v759_v37 }
 0x262   :  { %3887 = vmatpush1.bf16.msra.mxu0 %v4560_v29  ;;  %v767_v29 = vld [vmem:[#allocation7 + $0xd78] sm:$0xff] }
 0x263   :  { %4051 = vmatpush1.bf16.msra.mxu1 %v4562_v8  ;;  %3888 = vmatprep.subr.bf16.mxu0 %v4569_v15  ;;  %v4616_v8 = vcombine.low %v754_v54, %v758_v63  ;;  %v5167_v15 = vld [vmem:[#allocation8] sm:$0xff]  ;;  %v4627_v18 = vcombine.high %v763_v14, %v767_v29  ;;  %v790_v54 = vld [vmem:[#allocation7 + $0xe30] sm:$0xff] }
 0x264   :  { %4052 = vmatprep.subr.bf16.mxu1 %v4571_v16  ;;  %v4618_v16 = vcombine.low %v755_v6, %v759_v37  ;;  %v861_v19 = vrot.slane %v5167_v15, %v5034_v20  ;;  %v857_v25 = vrot.slane %v5167_v15, %v5045_v28  ;;  %v865_v30 = vrot.slane %v5167_v15, %v5043_v26  ;;  %v787_v6 = vld [vmem:[#allocation7 + $0xe18] sm:$0xff] }
 0x265   :  { %v791_v37 = vld [vmem:[#allocation7 + $0xe38] sm:$0xff] }
 0x266   :  { %3889 = vmatpush1.bf16.msra.mxu0 %v4568_v0  ;;  %v853_v0 = vrot.slane %v5167_v15, %v5040_v24 }
 0x267   :  { %4053 = vmatpush1.bf16.msra.mxu1 %v4570_v1  ;;  %3890 = vmatprep.subr.bf16.mxu0 %v4577_v2  ;;  %v771_v1 = vld [vmem:[#allocation7 + $0xd98] sm:$0xff] }
 0x268   :  { %4054 = vmatprep.subr.bf16.mxu1 %v4579_v4  ;;  %v775_v2 = vld [vmem:[#allocation7 + $0xdb8] sm:$0xff]  ;;  %v5171_v4 = vld [vmem:[#allocation10] sm:$0xff] }
 0x269   :  { %v4119_v39 = vrot.slane %v5171_v4, %v5040_v24  ;;  %v4634_v24 = vcombine.low %v771_v1, %v775_v2 }
 0x26a   :  { %3891 = vmatpush1.bf16.msra.mxu0 %v4576_v3  ;;  %v4626_v3 = vcombine.low %v763_v14, %v767_v29  ;;  %v4651_v29 = vcombine.high %v787_v6, %v791_v37 }
 0x26b   :  { %4055 = vmatpush1.bf16.msra.mxu1 %v4578_v5  ;;  %3901 = vmatprep.subr.bf16.mxu0 %v4585_v34  ;;  %v4633_v5 = vcombine.high %v770_v61, %v774_v62 }
 0x26c   :  { %4065 = vmatprep.subr.bf16.mxu1 %v4587_v44  ;;  %v4635_v44 = vcombine.high %v771_v1, %v775_v2 }
 0x26d   :  { %3893 = vmatmul.mubr.bf16.vlgmr.msra.gmra.mrb[4].mxu0 %v5140_v21 }
 0x26e   :  { %4057 = vmatmul.mubr.bf16.vlgmr.msra.gmra.mrb[4].mxu1 %v5140_v21  ;;  %3902 = vmatpush1.bf16.msra.mxu0 %v4584_v60  ;;  %v4602_v21 = vcombine.low %v739_v45, %v743_v49  ;;  %v4123_v45 = vrot.slane %v5171_v4, %v5045_v28 }
 0x26f   :  { %3933 = vmatprep.mubr.bf16.mxu0 %v5143_v33  ;;  %4066 = vmatpush1.bf16.msra.mxu1 %v4586_v41 }
 0x270   :  { %4097 = vmatprep.mubr.bf16.mxu1 %v5143_v33  ;;  %3903 = vmatprep.subr.bf16.mxu0 %v4593_v46  ;;  %v4608_v33 = vcombine.low %v746_v53, %v750_v55  ;;  %v779_v46 = vld [vmem:[#allocation7 + $0xdd8] sm:$0xff] }
 0x271   :  { %4067 = vmatprep.subr.bf16.mxu1 %v4595_v35  ;;  %v4643_v28 = vcombine.high %v779_v46, %v783_v42  ;;  %v4642_v12 = vcombine.low %v779_v46, %v783_v42 }
 0x272   :  { %3904 = vmatpush1.bf16.msra.mxu0 %v4592_v47 }
 0x273   :  { %4068 = vmatpush1.bf16.msra.mxu1 %v4594_v50  ;;  %3905 = vmatprep.subr.bf16.mxu0 %v4601_v52  ;;  %v4632_v50 = vcombine.low %v770_v61, %v774_v62 }
 0x274   :  { %4069 = vmatprep.subr.bf16.mxu1 %v4603_v48 }
 0x276   :  { %3906 = vmatpush1.bf16.msra.mxu0 %v4600_v51  ;;  %v4127_v51 = vrot.slane %v5171_v4, %v5034_v20 }
 0x277   :  { %4070 = vmatpush1.bf16.msra.mxu1 %v4602_v21  ;;  %3907 = vmatprep.subr.bf16.mxu0 %v4609_v58 }
 0x278   :  { %4071 = vmatprep.subr.bf16.mxu1 %v4611_v59  ;;  %v786_v59 = vld [vmem:[#allocation7 + $0xe10] sm:$0xff] }
 0x279   :  { %v4649_v20 = vcombine.high %v786_v59, %v790_v54 }
 0x27a   :  { %3908 = vmatpush1.bf16.msra.mxu0 %v4608_v33 }
 0x27b   :  { %4072 = vmatpush1.bf16.msra.mxu1 %v4610_v7  ;;  %3909 = vmatprep.subr.bf16.mxu0 %v4617_v9  ;;  %v4131_v9 = vrot.slane %v5171_v4, %v5043_v26  ;;  %v4650_v26 = vcombine.low %v787_v6, %v791_v37  ;;  %v839_v6 = vld [vmem:[#allocation7 + $0xfb8] sm:$0xff] }
 0x27c   :  { %4073 = vmatprep.subr.bf16.mxu1 %v4619_v10  ;;  %v4640_v10 = vcombine.low %v778_v36, %v782_v38  ;;  %v810_v38 = vld [vmem:[#allocation7 + $0xed0] sm:$0xff] }
 0x27e   :  { %3910 = vmatpush1.bf16.msra.mxu0 %v4616_v8  ;;  %v794_v8 = vld [vmem:[#allocation7 + $0xe50] sm:$0xff] }
 0x27f   :  { %4074 = vmatpush1.bf16.msra.mxu1 %v4618_v16  ;;  %3911 = vmatprep.subr.bf16.mxu0 %v4625_v17  ;;  %v798_v16 = vld [vmem:[#allocation7 + $0xe70] sm:$0xff]  ;;  %v795_v17 = vld [vmem:[#allocation7 + $0xe58] sm:$0xff] }
 0x280   :  { %v3607_v34 = vpop.f32.mrb[0].mxu0  ;;  %4075 = vmatprep.subr.bf16.mxu1 %v4627_v18  ;;  %v799_v18 = vld [vmem:[#allocation7 + $0xe78] sm:$0xff]  ;;  %v4657_v1 = vcombine.high %v794_v8, %v798_v16 }
 0x281   :  { %v4709_v60 = vadd.f32 %v3607_v34, %v853_v0  ;;  %v3771_v40 = vpop.f32.mrb[0].mxu1  ;;  %v3609_v41 = vpop.f32.mrb[1].mxu0  ;;  %v4648_v0 = vcombine.low %v786_v59, %v790_v54  ;;  %v4658_v34 = vcombine.low %v795_v17, %v799_v18  ;;  %v834_v59 = vld [vmem:[#allocation7 + $0xf90] sm:$0xff] }
 0x282   :  { %v4711_v43 = vadd.f32 %v3771_v40, %v861_v19  ;;  %v4710_v35 = vadd.f32 %v3609_v41, %v857_v25  ;;  %v3773_v49 = vpop.f32.mrb[1].mxu1  ;;  %v3611_v47 = vpop.f32.mrb[2].mxu0  ;;  %3912 = vmatpush1.bf16.msra.mxu0 %v4624_v27  ;;  %v4659_v19 = vcombine.high %v795_v17, %v799_v18  ;;  %v802_v25 = vld [vmem:[#allocation7 + $0xe90] sm:$0xff]  ;;  %v815_v40 = vld [vmem:[#allocation7 + $0xef8] sm:$0xff] }
 0x283   :  { %v4106_v52 = vmax.f32 %v4709_v60, 0.0  ;;  %v4712_v48 = vadd.f32 %v3773_v49, %v865_v30  ;;  %v3775_v53 = vpop.f32.mrb[2].mxu1  ;;  %4076 = vmatpush1.bf16.msra.mxu1 %v4626_v3  ;;  %v3612_v55 = vpop.f32.mrb[3].mxu0  ;;  %3913 = vmatprep.subr.bf16.mxu0 %v4633_v5  ;;  %v806_v27 = vld [vmem:[#allocation7 + $0xeb0] sm:$0xff]  ;;  %v803_v30 = vld [vmem:[#allocation7 + $0xe98] sm:$0xff]  ;;  %v4656_v5 = vcombine.low %v794_v8, %v798_v16 }
 0x284   :  { %v4108_v57 = vmax.f32 %v4711_v43, 0.0  ;;  %v4107_v21 = vmax.f32 %v4710_v35, 0.0  ;;  %v3776_v58 = vpop.f32.mrb[3].mxu1  ;;  %4077 = vmatprep.subr.bf16.mxu1 %v4635_v44  ;;  %v807_v3 = vld [vmem:[#allocation7 + $0xeb8] sm:$0xff]  ;;  %v4665_v44 = vcombine.high %v802_v25, %v806_v27  ;;  %v814_v60 = vld [vmem:[#allocation7 + $0xef0] sm:$0xff]  ;;  %v4664_v41 = vcombine.low %v802_v25, %v806_v27 }
 0x285   :  { %v4156_v63 = vmul.f32 %v4119_v39, %v4106_v52  ;;  %v4109_v7 = vmax.f32 %v4712_v48, 0.0  ;;  %v4667_v36 = vcombine.high %v803_v30, %v807_v3  ;;  %v811_v39 = vld [vmem:[#allocation7 + $0xed8] sm:$0xff]  ;;  %v4666_v46 = vcombine.low %v803_v30, %v807_v3  ;;  %v818_v35 = vld [vmem:[#allocation7 + $0xf10] sm:$0xff] }
 0x286   :  { %v4157_v33 = vmul.f32 %v4123_v45, %v4107_v21  ;;  %3914 = vmatpush1.bf16.msra.mxu0 %v4632_v50  ;;  %v4158_v13 = vmul.f32 %v4127_v51, %v4108_v57  ;;  %v4673_v42 = vcombine.high %v810_v38, %v814_v60  ;;  %v4675_v43 = vcombine.high %v811_v39, %v815_v40  ;;  %v822_v45 = vld [vmem:[#allocation7 + $0xf30] sm:$0xff]  ;;  %v819_v49 = vld [vmem:[#allocation7 + $0xf18] sm:$0xff] }
 0x287   :  { %4078 = vmatpush1.bf16.msra.mxu1 %v4634_v24  ;;  %3915 = vmatprep.subr.bf16.mxu0 %v4641_v56  ;;  %v4159_v61 = vmul.f32 %v4131_v9, %v4109_v7  ;;  %v823_v47 = vld [vmem:[#allocation7 + $0xf38] sm:$0xff]  ;;  %v4672_v50 = vcombine.low %v810_v38, %v814_v60  ;;  %v4674_v52 = vcombine.low %v811_v39, %v815_v40  ;;  %v826_v55 = vld [vmem:[#allocation7 + $0xf50] sm:$0xff] }
 0x288   :  { %v4164_v14 = vadd.f32 %v4157_v33, %v4156_v63  ;;  %4079 = vmatprep.subr.bf16.mxu1 %v4643_v28  ;;  %v4681_v48 = vcombine.high %v818_v35, %v822_v45  ;;  %v4683_v53 = vcombine.high %v819_v49, %v823_v47  ;;  %v830_v24 = vld [vmem:[#allocation7 + $0xf70] sm:$0xff]  ;;  %v827_v56 = vld [vmem:[#allocation7 + $0xf58] sm:$0xff]  ;;  %v4680_v51 = vcombine.low %v818_v35, %v822_v45 }
 0x289   :  { %v831_v57 = vld [vmem:[#allocation7 + $0xf78] sm:$0xff]  ;;  %v4682_v21 = vcombine.low %v819_v49, %v823_v47  ;;  %v4689_v58 = vcombine.high %v826_v55, %v830_v24  ;;  %v838_v54 = vld [vmem:[#allocation7 + $0xfb0] sm:$0xff]  ;;  %v4688_v37 = vcombine.low %v826_v55, %v830_v24  ;;  %v4135_v25 = vrot.slane %v5171_v4, %v5036_v22 }
 0x28a   :  { %v4165_v62 = vadd.f32 %v4164_v14, %v4158_v13  ;;  %3916 = vmatpush1.bf16.msra.mxu0 %v4640_v10  ;;  %v4691_v28 = vcombine.high %v827_v56, %v831_v57  ;;  %v835_v63 = vld [vmem:[#allocation7 + $0xf98] sm:$0xff]  ;;  %v4690_v33 = vcombine.low %v827_v56, %v831_v57  ;;  %v4697_v7 = vcombine.high %v834_v59, %v838_v54  ;;  %v842_v10 = vld [vmem:[#allocation7 + $0xfd0] sm:$0xff] }
 0x28b   :  { %4080 = vmatpush1.bf16.msra.mxu1 %v4642_v12  ;;  %3917 = vmatprep.subr.bf16.mxu0 %v4649_v20  ;;  %v4699_v9 = vcombine.high %v835_v63, %v839_v6  ;;  %v846_v12 = vld [vmem:[#allocation7 + $0xff0] sm:$0xff]  ;;  %v843_v20 = vld [vmem:[#allocation7 + $0xfd8] sm:$0xff]  ;;  %v4696_v14 = vcombine.low %v834_v59, %v838_v54 }
 0x28c   :  { %v5187_v2 = vadd.f32 %v4165_v62, %v4159_v61  ;;  %4081 = vmatprep.subr.bf16.mxu1 %v4651_v29  ;;  %v847_v13 = vld [vmem:[#allocation7 + $0xff8] sm:$0xff]  ;;  %v4698_v29 = vcombine.low %v835_v63, %v839_v6  ;;  %v4705_v8 = vcombine.high %v842_v10, %v846_v12  ;;  %v4704_v17 = vcombine.low %v842_v10, %v846_v12 }
 0x28d   :  { %v4707_v16 = vcombine.high %v843_v20, %v847_v13  ;;  %v4706_v18 = vcombine.low %v843_v20, %v847_v13  ;;  %v869_v61 = vrot.slane %v5167_v15, %v5036_v22  ;;  %v877_v62 = vrot.slane %v5167_v15, %v5038_v23 }
 0x28e   :  { %3918 = vmatpush1.bf16.msra.mxu0 %v4648_v0  ;;  %v873_v0 = vrot.slane %v5167_v15, %v5052_v32  ;;  %v4143_v22 = vrot.slane %v5171_v4, %v5038_v23 }
 0x28f   :  { %4082 = vmatpush1.bf16.msra.mxu1 %v4650_v26  ;;  %3919 = vmatprep.subr.bf16.mxu0 %v4657_v1  ;;  %v881_v26 = vrot.slane %v5167_v15, %v5050_v31 }
 0x290   :  { %4083 = vmatprep.subr.bf16.mxu1 %v4659_v19 }
 0x292   :  { %3920 = vmatpush1.bf16.msra.mxu0 %v4656_v5  ;;  %v4139_v5 = vrot.slane %v5171_v4, %v5052_v32  ;;  %v4147_v32 = vrot.slane %v5171_v4, %v5050_v31 }
 0x293   :  { %4084 = vmatpush1.bf16.msra.mxu1 %v4658_v34  ;;  %3921 = vmatprep.subr.bf16.mxu0 %v4665_v44 }
 0x294   :  { %4085 = vmatprep.subr.bf16.mxu1 %v4667_v36 }
 0x296   :  { %3922 = vmatpush1.bf16.msra.mxu0 %v4664_v41 }
 0x297   :  { %4086 = vmatpush1.bf16.msra.mxu1 %v4666_v46  ;;  %3923 = vmatprep.subr.bf16.mxu0 %v4673_v42 }
 0x298   :  { %4087 = vmatprep.subr.bf16.mxu1 %v4675_v43 }
 0x29a   :  { %3924 = vmatpush1.bf16.msra.mxu0 %v4672_v50 }
 0x29b   :  { %4088 = vmatpush1.bf16.msra.mxu1 %v4674_v52  ;;  %3925 = vmatprep.subr.bf16.mxu0 %v4681_v48  ;;  %v4708_v48 = vld [vmem:[#allocation2] ss:$0 sm:$0xff] }
 0x29c   :  { %4089 = vmatprep.subr.bf16.mxu1 %v4683_v53 }
 0x29e   :  { %3926 = vmatpush1.bf16.msra.mxu0 %v4680_v51 }
 0x29f   :  { %4090 = vmatpush1.bf16.msra.mxu1 %v4682_v21  ;;  %3927 = vmatprep.subr.bf16.mxu0 %v4689_v58 }
 0x2a0   :  { %4091 = vmatprep.subr.bf16.mxu1 %v4691_v28 }
 0x2a2   :  { %3928 = vmatpush1.bf16.msra.mxu0 %v4688_v37 }
 0x2a3   :  { %4092 = vmatpush1.bf16.msra.mxu1 %v4690_v33  ;;  %3929 = vmatprep.subr.bf16.mxu0 %v4697_v7 }
 0x2a4   :  { %4093 = vmatprep.subr.bf16.mxu1 %v4699_v9 }
 0x2a6   :  { %3930 = vmatpush1.bf16.msra.mxu0 %v4696_v14 }
 0x2a7   :  { %4094 = vmatpush1.bf16.msra.mxu1 %v4698_v29  ;;  %3931 = vmatprep.subr.bf16.mxu0 %v4705_v8 }
 0x2a8   :  { %4095 = vmatprep.subr.bf16.mxu1 %v4707_v16 }
 0x2aa   :  { %3932 = vmatpush1.bf16.msra.mxu0 %v4704_v17 }
 0x2ab   :  { %4096 = vmatpush1.bf16.msra.mxu1 %v4706_v18 }
 0x2ad   :  { %3934 = vmatmul.mubr.bf16.vlgmr.msra.gmra.mrb[4].mxu0 %v5149_v11 }
 0x2ae   :  { %4098 = vmatmul.mubr.bf16.vlgmr.msra.gmra.mrb[4].mxu1 %v5149_v11 }
 0x380   :  { %v3935_v1 = vpop.f32.mrb[4].mxu0 }
 0x381   :  { %v4713_v19 = vadd.f32 %v3935_v1, %v869_v61  ;;  %v4099_v27 = vpop.f32.mrb[4].mxu1  ;;  %v3937_v30 = vpop.f32.mrb[5].mxu0 }
 0x382   :  { %v4715_v11 = vadd.f32 %v4099_v27, %v877_v62  ;;  %v4714_v3 = vadd.f32 %v3937_v30, %v873_v0  ;;  %v4101_v34 = vpop.f32.mrb[5].mxu1  ;;  %v3939_v44 = vpop.f32.mrb[6].mxu0 }
 0x383   :  { %v4110_v36 = vmax.f32 %v4713_v19, 0.0  ;;  %v4716_v38 = vadd.f32 %v4101_v34, %v881_v26  ;;  %v4103_v60 = vpop.f32.mrb[6].mxu1  ;;  %v3940_v39 = vpop.f32.mrb[7].mxu0 }
 0x384   :  { %v4111_v40 = vmax.f32 %v4714_v3, 0.0  ;;  %v4104_v15 = vpop.f32.mrb[7].mxu1  ;;  %v4112_v46 = vmax.f32 %v4715_v11, 0.0 }
 0x385   :  { %v4160_v41 = vmul.f32 %v4135_v25, %v4110_v36  ;;  %v4113_v35 = vmax.f32 %v4716_v38, 0.0 }
 0x386   :  { %v4161_v42 = vmul.f32 %v4139_v5, %v4111_v40  ;;  %v4162_v45 = vmul.f32 %v4143_v22, %v4112_v46 }
 0x387   :  { %v4167_v43 = vadd.f32 %v5187_v2, %v4160_v41  ;;  %v4163_v47 = vmul.f32 %v4147_v32, %v4113_v35 }
 0x389   :  { %v4168_v49 = vadd.f32 %v4167_v43, %v4161_v42 }
 0x38b   :  { %v4169_v50 = vadd.f32 %v4168_v49, %v4162_v45 }
 0x38d   :  { %v4170_v52 = vadd.f32 %v4169_v50, %v4163_v47 }
 0x38f   :  { %4171 = vadd.xlane.f32.xlu1 %v4170_v52 }
 0x41c   :  { %v4172_v53 = vpop.xlane.xlu1 %4171 }
 0x41d   :  { %v4180_v55 = vadd.f32 %v4708_v48, %v4172_v53 }
 0x41f   :  { %v4181_v24 = vsub.f32 0.0, %v4180_v55 }
 0x421   :  { %v4182_v56 = vmul.f32 1.442695, %v4181_v24 }
 0x423   :  { %4776 = vpow2.f32 %v4182_v56 }
 0x42d   :  { %v4777_v23 = vpop.eup %4776 }
 0x42e   :  { %v4184_v57 = vadd.f32 1.0, %v4777_v23 }
 0x430   :  { %4778 = vrcp.f32 %v4184_v57 }
 0x43a   :  { %v4779_v2 = vpop.eup %4778 }
 0x43b   :  { %4188 = vst.msk [vmem:[%s5218_s7] sm:$0xff] %vm4187_vm0, %v4779_v2 }
 0x43c   :  { %4193 = vsyncpa [#allocation4], 1 }
 0x43d   :  { %4194 = vsyncpa [#allocation6], 1 }
 0x43e   :  { %4195 = vsyncpa [#allocation9], 1 }

</bundles_post_ra>
